<compile_context>
chip_gen: v7x
topology: tpu7x:2x2x1
jax: 0.10.0
libtpu: 0.0.40
codegen_flags: <defaults>
</compile_context>

<pallas_src>
import numpy as np
import jax
import jax.numpy as jnp
from jax.experimental import pallas as pl
from jax.experimental.pallas import tpu as pltpu


# ---------------------------------------------------------------------------
# Fused Pallas kernel.  One grid step processes Bt lane-folded batch samples.
# Activation layout: (Cin*H, Bt*W)  -- channel-major rows, batch-major lanes.
# ---------------------------------------------------------------------------

def _idn_kernel(x_ref,
                c1s_ref, c1w_ref, c1b_ref,
                c2s_ref, c2w_ref, c2b_ref,
                c34s_ref, c3w_ref, c3b_ref, c4w_ref, c4b_ref,
                rw1_ref, rw2_ref, gxm_ref, g2m_ref, ex_ref, ew_ref,
                wmu_ref, wsg_ref, lb_ref,
                content_ref, style_ref):
    f32 = jnp.float32
    C = gxm_ref.shape[0]
    CH = gxm_ref.shape[1]
    H = CH // C
    Bt = ew_ref.shape[0]
    W = ew_ref.shape[1] // Bt
    n = H * W

    def conv(h, sel_ref, w_ref, b_ref):
        """Structured conv:  out = W2cat @ [h@SEL_0 ; ... ; h@SEL_{KW-1}] + b, LReLU(0.1).

        SEL_k absorbs W-padding/stride (block-diag over the Bt folded samples),
        W2cat absorbs H-padding/stride + tap/channel mixing (one MXU dot)."""
        KW = sel_ref.shape[0]
        cols = jnp.concatenate(
            [jnp.dot(h, sel_ref[k], preferred_element_type=f32) for k in range(KW)],
            axis=0)                                            # (KW*Cin*Hin, Bt*OW)
        acc = jnp.dot(w_ref[...], cols, preferred_element_type=f32) + b_ref[...]
        return jnp.where(acc >= 0.0, acc, 0.1 * acc)

    x2 = x_ref[0].astype(f32)                                  # (C*H, Bt*W)

    # ---- style_mu_conv: 4x4/s2 -> LReLU -> 4x4/s2 -> LReLU -> AvgPool(1) ----
    h1 = conv(x2, c1s_ref, c1w_ref, c1b_ref)                   # (C*OH1, Bt*OW1)
    h2 = conv(h1, c2s_ref, c2w_ref, c2b_ref)                   # (C*OH2, Bt*OW2)
    mu = jnp.dot(g2m_ref[...],
                 jnp.dot(h2, rw2_ref[...], preferred_element_type=f32),
                 preferred_element_type=f32)                   # (C, Bt), 1/(OH2*OW2) folded

    # ---- instance statistics: unbiased per-(channel,sample) std of x --------
    mean_x = jnp.dot(gxm_ref[...],
                     jnp.dot(x2, rw1_ref[...], preferred_element_type=f32),
                     preferred_element_type=f32)               # (C, Bt), 1/n folded in
    mean_bc = jnp.dot(ex_ref[...],
                      jnp.dot(mean_x, ew_ref[...], preferred_element_type=f32),
                      preferred_element_type=f32)              # (C*H, Bt*W)
    cent = x2 - mean_bc
    ssn = jnp.dot(gxm_ref[...],
                  jnp.dot(cent * cent, rw1_ref[...], preferred_element_type=f32),
                  preferred_element_type=f32)                  # (C, Bt) = sum(cent^2)/n
    var = ssn * (float(n) / float(n - 1))                      # unbiased variance
    sigma = jnp.sqrt(var)                                      # (C, Bt)
    inv_sigma = 1.0 / sigma                                    # tiny divide only

    # ---- content normalization as a lane-dense affine: x*bc(1/s) - bc(mu/s) --
    inv_bc = jnp.dot(ex_ref[...],
                     jnp.dot(inv_sigma, ew_ref[...], preferred_element_type=f32),
                     preferred_element_type=f32)               # (C*H, Bt*W)
    off_bc = jnp.dot(ex_ref[...],
                     jnp.dot(mu * inv_sigma, ew_ref[...], preferred_element_type=f32),
                     preferred_element_type=f32)               # (C*H, Bt*W)
    content_feat = x2 * inv_bc - off_bc                        # == (x - mu) / sigma

    # ---- to_style: Linear(2C -> S) on [mu, sigma], batch along lanes --------
    style = (jnp.dot(wmu_ref[...], mu, preferred_element_type=f32)
             + jnp.dot(wsg_ref[...], sigma, preferred_element_type=f32)
             + lb_ref[...])                                    # (S, Bt)
    style_ref[0] = style.astype(style_ref.dtype)

    # ---- to_content: two 3x3/s1 convs + LReLU -------------------------------
    t1 = conv(content_feat, c34s_ref, c3w_ref, c3b_ref)        # (C*H, Bt*W)
    t2 = conv(t1, c34s_ref, c4w_ref, c4b_ref)                  # (CC*H, Bt*W)
    # TODO(synk): AdaptiveAvgPool2d(16) is the identity for 16x16 spatial input;
    # other input sizes would need an extra in-kernel pooling matmul here.
    content_ref[0] = t2.astype(content_ref.dtype)


# ---------------------------------------------------------------------------
# Wrapper
# ---------------------------------------------------------------------------

_CONST_NAMES = ("c1_sel", "c1_w", "c1_b", "c2_sel", "c2_w", "c2_b",
                "c34_sel", "c3_w", "c3_b", "c4_w", "c4_b",
                "rw1", "rw2", "gxm", "g2m", "ex", "ew", "w_mu", "w_sg", "lb")


def _const_spec(arr):
    nd = arr.ndim
    return pl.BlockSpec(arr.shape, lambda g, _nd=nd: (0,) * _nd)


def choose_bt(batch, width):
    """Samples folded per grid step: fill the 128-lane axis but keep >= 2 grid
    steps when possible so both v7x TensorCores get work (no-op on v5e/v6e)."""
    cap = max(1, 128 // width)
    if batch >= 2:
        cap = min(cap, (batch + 1) // 2)
    bt = 1
    for d in range(1, batch + 1):
        if batch % d == 0 and d <= cap:
            bt = d
    return bt


@jax.jit
def idn_forward(feat, kp):
    """feat: (B, C, H, W) NCHW float32 -> (content (B, CC, H, W), style (B, S))."""
    B, C, H, W = feat.shape
    Bt = kp["ew"].shape[0]
    G = B // Bt
    S = kp["w_mu"].shape[0]
    CCH = kp["c4_w"].shape[0]
    CC = CCH // H

    # Lane-fold Bt samples per step: (B,C,H,W) -> (G, C*H, Bt*W).  Done as cheap
    # XLA reshapes/transposes in HBM, so there are no in-kernel relayouts.
    xf = feat.reshape(G, Bt, C * H, W).transpose(0, 2, 1, 3).reshape(G, C * H, Bt * W)

    consts = [kp[name] for name in _CONST_NAMES]
    content_f, style_f = pl.pallas_call(
        _idn_kernel,
        out_shape=(jax.ShapeDtypeStruct((G, CCH, Bt * W), feat.dtype),
                   jax.ShapeDtypeStruct((G, S, Bt), feat.dtype)),
        grid=(G,),
        in_specs=[pl.BlockSpec((1, C * H, Bt * W), lambda g: (g, 0, 0))]
                 + [_const_spec(a) for a in consts],
        out_specs=(pl.BlockSpec((1, CCH, Bt * W), lambda g: (g, 0, 0)),
                   pl.BlockSpec((1, S, Bt), lambda g: (g, 0, 0))),
        compiler_params=pltpu.CompilerParams(dimension_semantics=("parallel",)),
    )(xf, *consts)

    content = (content_f.reshape(G, CC, H, Bt, W)
               .transpose(0, 3, 1, 2, 4).reshape(B, CC, H, W))
    style = style_f.transpose(0, 2, 1).reshape(B, S)
    return content, style


# ---------------------------------------------------------------------------
# Parameter init + structured-matrix preprocessing (numpy, done once)
# ---------------------------------------------------------------------------

def _spectral_normalize(w_oihw, n_iter=50):
    wm = w_oihw.reshape(w_oihw.shape[0], -1).astype(np.float64)
    u = np.ones((wm.shape[0],), np.float64)
    u /= np.linalg.norm(u) + 1e-12
    for _ in range(n_iter):
        v = wm.T @ u
        v /= np.linalg.norm(v) + 1e-12
        u = wm @ v
        u /= np.linalg.norm(u) + 1e-12
    sigma = float(u @ wm @ v)
    return (w_oihw / sigma).astype(np.float32)


def init_params(key, C, style_dim, content_channel):
    ks = jax.random.split(key, 10)

    def nrm(k, shape, scale):
        return np.asarray(jax.random.normal(k, shape, jnp.float32)) * scale

    return {
        "w1": _spectral_normalize(nrm(ks[0], (C, C, 4, 4), 0.3)),
        "b1": nrm(ks[1], (C,), 0.05),
        "w2": _spectral_normalize(nrm(ks[2], (C, C, 4, 4), 0.3)),
        "b2": nrm(ks[3], (C,), 0.05),
        "w3": _spectral_normalize(nrm(ks[4], (C, C, 3, 3), 0.3)),
        "b3": nrm(ks[5], (C,), 0.05),
        "w4": _spectral_normalize(nrm(ks[6], (content_channel, C, 3, 3), 0.3)),
        "b4": nrm(ks[7], (content_channel,), 0.05),
        "lw": nrm(ks[8], (style_dim, 2 * C), 1.0 / np.sqrt(2 * C)),
        "lb": nrm(ks[9], (style_dim,), 0.05),
    }


def _conv_consts(w_oihw, bias, Hin, Win, stride, pad, Bt):
    """Constants so that conv = W2cat @ stack_k(x2 @ SEL_k) + b in (C*H, Bt*W) layout."""
    Cout, Cin, KH, KW = w_oihw.shape
    OH = (Hin + 2 * pad - KH) // stride + 1
    OW = (Win + 2 * pad - KW) // stride + 1
    # Per-tap column selection (absorbs W-padding + stride), block-diag over Bt samples.
    sel = np.zeros((KW, Win, OW), np.float32)
    for kw in range(KW):
        for j in range(OW):
            q = stride * j + kw - pad
            if 0 <= q < Win:
                sel[kw, q, j] = 1.0
    eye_bt = np.eye(Bt, dtype=np.float32)
    sel_blk = np.stack([np.kron(eye_bt, sel[kw]) for kw in range(KW)], axis=0)
    # Per-tap row/tap/channel mix (absorbs H-padding + stride), concatenated over taps
    # so the kernel needs ONE matmul per conv.
    # TODO(synk): for large C this dense W2 should be split into per-kh bands (or a k
    # grid axis) to avoid ~KH x wasted FLOPs/VMEM, which matters first on v7x (64 MiB).
    w2 = np.zeros((KW, Cout * OH, Cin * Hin), np.float32)
    for kw in range(KW):
        for co in range(Cout):
            for i in range(OH):
                for kh in range(KH):
                    h = stride * i + kh - pad
                    if 0 <= h < Hin:
                        for c in range(Cin):
                            w2[kw, co * OH + i, c * Hin + h] = w_oihw[co, c, kh, kw]
    w2cat = np.concatenate([w2[kw] for kw in range(KW)], axis=1)   # (Cout*OH, KW*Cin*Hin)
    brep = np.repeat(np.asarray(bias, np.float32), OH)[:, None]    # (Cout*OH, 1)
    return sel_blk, w2cat, brep, OH, OW


def prepare_kernel_params(p, H, W, Bt):
    C = p["w1"].shape[0]
    c1s, c1w, c1b, OH1, OW1 = _conv_consts(p["w1"], p["b1"], H, W, 2, 1, Bt)
    c2s, c2w, c2b, OH2, OW2 = _conv_consts(p["w2"], p["b2"], OH1, OW1, 2, 1, Bt)
    c3s, c3w, c3b, _, _ = _conv_consts(p["w3"], p["b3"], H, W, 1, 1, Bt)
    _c4s, c4w, c4b, _, _ = _conv_consts(p["w4"], p["b4"], H, W, 1, 1, Bt)
    # conv3 / conv4 share geometry -> share one SEL constant (c34_sel).

    eye_c = np.eye(C, dtype=np.float32)
    eye_bt = np.eye(Bt, dtype=np.float32)
    kp = {
        "c1_sel": c1s, "c1_w": c1w, "c1_b": c1b,
        "c2_sel": c2s, "c2_w": c2w, "c2_b": c2b,
        "c34_sel": c3s, "c3_w": c3w, "c3_b": c3b, "c4_w": c4w, "c4_b": c4b,
        # per-sample lane-group column sums
        "rw1": np.kron(eye_bt, np.ones((W, 1), np.float32)),
        "rw2": np.kron(eye_bt, np.ones((OW2, 1), np.float32)),
        # per-channel row-group means (1/n scalings folded in -> no runtime divides)
        "gxm": np.kron(eye_c, np.ones((1, H), np.float32)) / float(H * W),
        "g2m": np.kron(eye_c, np.ones((1, OH2), np.float32)) / float(OH2 * OW2),
        # broadcast expanders: channel -> rows, sample -> lanes
        "ex": np.kron(eye_c, np.ones((H, 1), np.float32)),
        "ew": np.kron(eye_bt, np.ones((1, W), np.float32)),
        "w_mu": np.asarray(p["lw"][:, :C], np.float32),
        "w_sg": np.asarray(p["lw"][:, C:], np.float32),
        "lb": np.asarray(p["lb"], np.float32)[:, None],
    }
    return {k: jnp.asarray(v) for k, v in kp.items()}


# ---------------------------------------------------------------------------
# Pure numpy reference (mirrors the PyTorch forward exactly)
# ---------------------------------------------------------------------------

def _ref_conv2d(x, w_oihw, bias, stride, pad):
    B, Cin, H, W = x.shape
    Cout, _, KH, KW = w_oihw.shape
    xp = np.pad(x, ((0, 0), (0, 0), (pad, pad), (pad, pad)))
    OH = (H + 2 * pad - KH) // stride + 1
    OW = (W + 2 * pad - KW) // stride + 1
    out = np.zeros((B, Cout, OH, OW), np.float64)
    for b in range(B):
        for co in range(Cout):
            for i in range(OH):
                for j in range(OW):
                    patch = xp[b, :, i * stride:i * stride + KH,
                               j * stride:j * stride + KW]
                    out[b, co, i, j] = np.sum(patch * w_oihw[co]) + bias[co]
    return out


def _lrelu(x):
    return np.where(x >= 0, x, 0.1 * x)


def ref_forward(feat_nchw, p):
    x = feat_nchw.astype(np.float64)
    B, C, _, _ = x.shape
    h = _lrelu(_ref_conv2d(x, p["w1"].astype(np.float64), p["b1"], 2, 1))
    h = _lrelu(_ref_conv2d(h, p["w2"].astype(np.float64), p["b2"], 2, 1))
    style_mu = h.mean(axis=(2, 3))
    diff = x - style_mu[:, :, None, None]
    sigma = diff.reshape(B, C, -1).std(axis=-1, ddof=1)
    feat_content = diff / sigma[:, :, None, None]
    style = (np.concatenate([style_mu, sigma], axis=1) @ p["lw"].astype(np.float64).T
             + p["lb"].astype(np.float64))
    c = _lrelu(_ref_conv2d(feat_content, p["w3"].astype(np.float64), p["b3"], 1, 1))
    c = _lrelu(_ref_conv2d(c, p["w4"].astype(np.float64), p["b4"], 1, 1))
    return c, style                                   # AdaptiveAvgPool2d(16) is identity


# ---------------------------------------------------------------------------

if __name__ == "__main__":
    C, H, W = 4, 16, 16
    style_dim, content_channel = 8, 1
    assert H == 16 and W == 16   # AdaptiveAvgPool2d(16) identity case (see TODO in kernel)

    key = jax.random.PRNGKey(0)
    k_feat1, k_feat2, k_params = jax.random.split(key, 3)
    params_np = init_params(k_params, C, style_dim, content_channel)

    # B=2: Bt=1, grid=2 (keeps both v7x TCs busy).  B=4: Bt=2, grid=2 (exercises the
    # lane-folded block-diagonal path).
    for B, kf in ((2, k_feat1), (4, k_feat2)):
        feat = jax.random.normal(kf, (B, C, H, W), jnp.float32)        # NCHW
        Bt = choose_bt(B, W)
        kparams = prepare_kernel_params(params_np, H, W, Bt)

        content, style = idn_forward(feat, kparams)
        jax.block_until_ready((content, style))

        ref_content, ref_style = ref_forward(np.asarray(feat), params_np)
        np.testing.assert_allclose(np.asarray(content), ref_content, rtol=1e-2, atol=5e-3)
        np.testing.assert_allclose(np.asarray(style), ref_style, rtol=1e-2, atol=5e-3)

        assert content.shape == (B, content_channel, 16, 16)
        assert style.shape == (B, style_dim)

    print("KERNEL_OK")
</pallas_src>

<mosaic_0001>
module attributes {stable_mosaic.version = 11 : i64} {
  func.func @_idn_kernel(%arg0: i32, %arg1: memref<1x64x16xf32, #tpu.memory_space<vmem>>, %arg2: memref<4x16x8xf32, #tpu.memory_space<vmem>>, %arg3: memref<32x256xf32, #tpu.memory_space<vmem>>, %arg4: memref<32x1xf32, #tpu.memory_space<vmem>>, %arg5: memref<4x8x4xf32, #tpu.memory_space<vmem>>, %arg6: memref<16x128xf32, #tpu.memory_space<vmem>>, %arg7: memref<16x1xf32, #tpu.memory_space<vmem>>, %arg8: memref<3x16x16xf32, #tpu.memory_space<vmem>>, %arg9: memref<64x192xf32, #tpu.memory_space<vmem>>, %arg10: memref<64x1xf32, #tpu.memory_space<vmem>>, %arg11: memref<16x192xf32, #tpu.memory_space<vmem>>, %arg12: memref<16x1xf32, #tpu.memory_space<vmem>>, %arg13: memref<16x1xf32, #tpu.memory_space<vmem>>, %arg14: memref<4x1xf32, #tpu.memory_space<vmem>>, %arg15: memref<4x64xf32, #tpu.memory_space<vmem>>, %arg16: memref<4x16xf32, #tpu.memory_space<vmem>>, %arg17: memref<64x4xf32, #tpu.memory_space<vmem>>, %arg18: memref<1x16xf32, #tpu.memory_space<vmem>>, %arg19: memref<8x4xf32, #tpu.memory_space<vmem>>, %arg20: memref<8x4xf32, #tpu.memory_space<vmem>>, %arg21: memref<8x1xf32, #tpu.memory_space<vmem>>, %arg22: memref<1x16x16xf32, #tpu.memory_space<vmem>>, %arg23: memref<1x8x1xf32, #tpu.memory_space<vmem>>) attributes {dimension_semantics = [#tpu.dimension_semantics<parallel>], iteration_bounds = array<i64: 2>, scalar_prefetch = 0 : i64, scratch_operands = 0 : i64, tpu.core_type = #tpu.core_type<tc>, window_params = [{transform_indices = @transform_0, window_bounds = array<i64: 1, 64, 16>}, {pipeline_mode = #tpu.pipeline_mode<synchronous>, transform_indices = @transform_1, window_bounds = array<i64: 4, 16, 8>}, {pipeline_mode = #tpu.pipeline_mode<synchronous>, transform_indices = @transform_2, window_bounds = array<i64: 32, 256>}, {pipeline_mode = #tpu.pipeline_mode<synchronous>, transform_indices = @transform_3, window_bounds = array<i64: 32, 1>}, {pipeline_mode = #tpu.pipeline_mode<synchronous>, transform_indices = @transform_4, window_bounds = array<i64: 4, 8, 4>}, {pipeline_mode = #tpu.pipeline_mode<synchronous>, transform_indices = @transform_5, window_bounds = array<i64: 16, 128>}, {pipeline_mode = #tpu.pipeline_mode<synchronous>, transform_indices = @transform_6, window_bounds = array<i64: 16, 1>}, {pipeline_mode = #tpu.pipeline_mode<synchronous>, transform_indices = @transform_7, window_bounds = array<i64: 3, 16, 16>}, {pipeline_mode = #tpu.pipeline_mode<synchronous>, transform_indices = @transform_8, window_bounds = array<i64: 64, 192>}, {pipeline_mode = #tpu.pipeline_mode<synchronous>, transform_indices = @transform_9, window_bounds = array<i64: 64, 1>}, {pipeline_mode = #tpu.pipeline_mode<synchronous>, transform_indices = @transform_10, window_bounds = array<i64: 16, 192>}, {pipeline_mode = #tpu.pipeline_mode<synchronous>, transform_indices = @transform_11, window_bounds = array<i64: 16, 1>}, {pipeline_mode = #tpu.pipeline_mode<synchronous>, transform_indices = @transform_12, window_bounds = array<i64: 16, 1>}, {pipeline_mode = #tpu.pipeline_mode<synchronous>, transform_indices = @transform_13, window_bounds = array<i64: 4, 1>}, {pipeline_mode = #tpu.pipeline_mode<synchronous>, transform_indices = @transform_14, window_bounds = array<i64: 4, 64>}, {pipeline_mode = #tpu.pipeline_mode<synchronous>, transform_indices = @transform_15, window_bounds = array<i64: 4, 16>}, {pipeline_mode = #tpu.pipeline_mode<synchronous>, transform_indices = @transform_16, window_bounds = array<i64: 64, 4>}, {pipeline_mode = #tpu.pipeline_mode<synchronous>, transform_indices = @transform_17, window_bounds = array<i64: 1, 16>}, {pipeline_mode = #tpu.pipeline_mode<synchronous>, transform_indices = @transform_18, window_bounds = array<i64: 8, 4>}, {pipeline_mode = #tpu.pipeline_mode<synchronous>, transform_indices = @transform_19, window_bounds = array<i64: 8, 4>}, {pipeline_mode = #tpu.pipeline_mode<synchronous>, transform_indices = @transform_20, window_bounds = array<i64: 8, 1>}, {transform_indices = @transform_21, window_bounds = array<i64: 1, 16, 16>}, {transform_indices = @transform_22, window_bounds = array<i64: 1, 8, 1>}]} {
    %c0 = arith.constant 0 : index
    %c0_0 = arith.constant 0 : index
    %c0_1 = arith.constant 0 : index
    %0 = vector.load %arg1[%c0, %c0_0, %c0_1] : memref<1x64x16xf32, #tpu.memory_space<vmem>>, vector<1x64x16xf32>
    %1 = vector.shape_cast %0 : vector<1x64x16xf32> to vector<64x16xf32>
    %c0_2 = arith.constant 0 : index
    %c0_3 = arith.constant 0 : index
    %c0_4 = arith.constant 0 : index
    %2 = vector.load %arg2[%c0_2, %c0_3, %c0_4] : memref<4x16x8xf32, #tpu.memory_space<vmem>>, vector<1x16x8xf32>
    %3 = vector.shape_cast %2 : vector<1x16x8xf32> to vector<16x8xf32>
    %cst = arith.constant dense<0.000000e+00> : vector<64x8xf32>
    %4 = tpu.matmul %1, %3, %cst {dimension_numbers = #tpu.dot_dimension_numbers<[1], [0], [0], [1], [0, 0, 1, 1], [], []>} : vector<64x16xf32>, vector<16x8xf32>, vector<64x8xf32> -> vector<64x8xf32>
    %c1 = arith.constant 1 : index
    %c0_5 = arith.constant 0 : index
    %c0_6 = arith.constant 0 : index
    %5 = vector.load %arg2[%c1, %c0_5, %c0_6] : memref<4x16x8xf32, #tpu.memory_space<vmem>>, vector<1x16x8xf32>
    %6 = vector.shape_cast %5 : vector<1x16x8xf32> to vector<16x8xf32>
    %cst_7 = arith.constant dense<0.000000e+00> : vector<64x8xf32>
    %7 = tpu.matmul %1, %6, %cst_7 {dimension_numbers = #tpu.dot_dimension_numbers<[1], [0], [0], [1], [0, 0, 1, 1], [], []>} : vector<64x16xf32>, vector<16x8xf32>, vector<64x8xf32> -> vector<64x8xf32>
    %c2 = arith.constant 2 : index
    %c0_8 = arith.constant 0 : index
    %c0_9 = arith.constant 0 : index
    %8 = vector.load %arg2[%c2, %c0_8, %c0_9] : memref<4x16x8xf32, #tpu.memory_space<vmem>>, vector<1x16x8xf32>
    %9 = vector.shape_cast %8 : vector<1x16x8xf32> to vector<16x8xf32>
    %cst_10 = arith.constant dense<0.000000e+00> : vector<64x8xf32>
    %10 = tpu.matmul %1, %9, %cst_10 {dimension_numbers = #tpu.dot_dimension_numbers<[1], [0], [0], [1], [0, 0, 1, 1], [], []>} : vector<64x16xf32>, vector<16x8xf32>, vector<64x8xf32> -> vector<64x8xf32>
    %c3 = arith.constant 3 : index
    %c0_11 = arith.constant 0 : index
    %c0_12 = arith.constant 0 : index
    %11 = vector.load %arg2[%c3, %c0_11, %c0_12] : memref<4x16x8xf32, #tpu.memory_space<vmem>>, vector<1x16x8xf32>
    %12 = vector.shape_cast %11 : vector<1x16x8xf32> to vector<16x8xf32>
    %cst_13 = arith.constant dense<0.000000e+00> : vector<64x8xf32>
    %13 = tpu.matmul %1, %12, %cst_13 {dimension_numbers = #tpu.dot_dimension_numbers<[1], [0], [0], [1], [0, 0, 1, 1], [], []>} : vector<64x16xf32>, vector<16x8xf32>, vector<64x8xf32> -> vector<64x8xf32>
    %14 = tpu.concatenate %4, %7, %10, %13 in 0 : vector<64x8xf32>, vector<64x8xf32>, vector<64x8xf32>, vector<64x8xf32> -> vector<256x8xf32>
    %c0_14 = arith.constant 0 : index
    %c0_15 = arith.constant 0 : index
    %15 = vector.load %arg3[%c0_14, %c0_15] : memref<32x256xf32, #tpu.memory_space<vmem>>, vector<32x256xf32>
    %cst_16 = arith.constant dense<0.000000e+00> : vector<32x8xf32>
    %16 = tpu.matmul %15, %14, %cst_16 {dimension_numbers = #tpu.dot_dimension_numbers<[1], [0], [0], [1], [0, 0, 1, 1], [], []>} : vector<32x256xf32>, vector<256x8xf32>, vector<32x8xf32> -> vector<32x8xf32>
    %c0_17 = arith.constant 0 : index
    %c0_18 = arith.constant 0 : index
    %17 = vector.load %arg4[%c0_17, %c0_18] : memref<32x1xf32, #tpu.memory_space<vmem>>, vector<32x1xf32>
    %18 = vector.broadcast %17 : vector<32x1xf32> to vector<32x8xf32>
    %19 = arith.addf %16, %18 : vector<32x8xf32>
    %cst_19 = arith.constant 0.000000e+00 : f32
    %20 = vector.broadcast %cst_19 : f32 to vector<32x8xf32>
    %21 = arith.cmpf oge, %19, %20 : vector<32x8xf32>
    %cst_20 = arith.constant 1.000000e-01 : f32
    %22 = vector.broadcast %cst_20 : f32 to vector<32x8xf32>
    %23 = arith.mulf %22, %19 : vector<32x8xf32>
    %24 = arith.select %21, %19, %23 : vector<32x8xi1>, vector<32x8xf32>
    %c0_21 = arith.constant 0 : index
    %c0_22 = arith.constant 0 : index
    %c0_23 = arith.constant 0 : index
    %25 = vector.load %arg5[%c0_21, %c0_22, %c0_23] : memref<4x8x4xf32, #tpu.memory_space<vmem>>, vector<1x8x4xf32>
    %26 = vector.shape_cast %25 : vector<1x8x4xf32> to vector<8x4xf32>
    %cst_24 = arith.constant dense<0.000000e+00> : vector<32x4xf32>
    %27 = tpu.matmul %24, %26, %cst_24 {dimension_numbers = #tpu.dot_dimension_numbers<[1], [0], [0], [1], [0, 0, 1, 1], [], []>} : vector<32x8xf32>, vector<8x4xf32>, vector<32x4xf32> -> vector<32x4xf32>
    %c1_25 = arith.constant 1 : index
    %c0_26 = arith.constant 0 : index
    %c0_27 = arith.constant 0 : index
    %28 = vector.load %arg5[%c1_25, %c0_26, %c0_27] : memref<4x8x4xf32, #tpu.memory_space<vmem>>, vector<1x8x4xf32>
    %29 = vector.shape_cast %28 : vector<1x8x4xf32> to vector<8x4xf32>
    %cst_28 = arith.constant dense<0.000000e+00> : vector<32x4xf32>
    %30 = tpu.matmul %24, %29, %cst_28 {dimension_numbers = #tpu.dot_dimension_numbers<[1], [0], [0], [1], [0, 0, 1, 1], [], []>} : vector<32x8xf32>, vector<8x4xf32>, vector<32x4xf32> -> vector<32x4xf32>
    %c2_29 = arith.constant 2 : index
    %c0_30 = arith.constant 0 : index
    %c0_31 = arith.constant 0 : index
    %31 = vector.load %arg5[%c2_29, %c0_30, %c0_31] : memref<4x8x4xf32, #tpu.memory_space<vmem>>, vector<1x8x4xf32>
    %32 = vector.shape_cast %31 : vector<1x8x4xf32> to vector<8x4xf32>
    %cst_32 = arith.constant dense<0.000000e+00> : vector<32x4xf32>
    %33 = tpu.matmul %24, %32, %cst_32 {dimension_numbers = #tpu.dot_dimension_numbers<[1], [0], [0], [1], [0, 0, 1, 1], [], []>} : vector<32x8xf32>, vector<8x4xf32>, vector<32x4xf32> -> vector<32x4xf32>
    %c3_33 = arith.constant 3 : index
    %c0_34 = arith.constant 0 : index
    %c0_35 = arith.constant 0 : index
    %34 = vector.load %arg5[%c3_33, %c0_34, %c0_35] : memref<4x8x4xf32, #tpu.memory_space<vmem>>, vector<1x8x4xf32>
    %35 = vector.shape_cast %34 : vector<1x8x4xf32> to vector<8x4xf32>
    %cst_36 = arith.constant dense<0.000000e+00> : vector<32x4xf32>
    %36 = tpu.matmul %24, %35, %cst_36 {dimension_numbers = #tpu.dot_dimension_numbers<[1], [0], [0], [1], [0, 0, 1, 1], [], []>} : vector<32x8xf32>, vector<8x4xf32>, vector<32x4xf32> -> vector<32x4xf32>
    %37 = tpu.concatenate %27, %30, %33, %36 in 0 : vector<32x4xf32>, vector<32x4xf32>, vector<32x4xf32>, vector<32x4xf32> -> vector<128x4xf32>
    %c0_37 = arith.constant 0 : index
    %c0_38 = arith.constant 0 : index
    %38 = vector.load %arg6[%c0_37, %c0_38] : memref<16x128xf32, #tpu.memory_space<vmem>>, vector<16x128xf32>
    %cst_39 = arith.constant dense<0.000000e+00> : vector<16x4xf32>
    %39 = tpu.matmul %38, %37, %cst_39 {dimension_numbers = #tpu.dot_dimension_numbers<[1], [0], [0], [1], [0, 0, 1, 1], [], []>} : vector<16x128xf32>, vector<128x4xf32>, vector<16x4xf32> -> vector<16x4xf32>
    %c0_40 = arith.constant 0 : index
    %c0_41 = arith.constant 0 : index
    %40 = vector.load %arg7[%c0_40, %c0_41] : memref<16x1xf32, #tpu.memory_space<vmem>>, vector<16x1xf32>
    %41 = vector.broadcast %40 : vector<16x1xf32> to vector<16x4xf32>
    %42 = arith.addf %39, %41 : vector<16x4xf32>
    %cst_42 = arith.constant 0.000000e+00 : f32
    %43 = vector.broadcast %cst_42 : f32 to vector<16x4xf32>
    %44 = arith.cmpf oge, %42, %43 : vector<16x4xf32>
    %cst_43 = arith.constant 1.000000e-01 : f32
    %45 = vector.broadcast %cst_43 : f32 to vector<16x4xf32>
    %46 = arith.mulf %45, %42 : vector<16x4xf32>
    %47 = arith.select %44, %42, %46 : vector<16x4xi1>, vector<16x4xf32>
    %c0_44 = arith.constant 0 : index
    %c0_45 = arith.constant 0 : index
    %48 = vector.load %arg16[%c0_44, %c0_45] : memref<4x16xf32, #tpu.memory_space<vmem>>, vector<4x16xf32>
    %c0_46 = arith.constant 0 : index
    %c0_47 = arith.constant 0 : index
    %49 = vector.load %arg14[%c0_46, %c0_47] : memref<4x1xf32, #tpu.memory_space<vmem>>, vector<4x1xf32>
    %cst_48 = arith.constant dense<0.000000e+00> : vector<16x1xf32>
    %50 = tpu.matmul %47, %49, %cst_48 {dimension_numbers = #tpu.dot_dimension_numbers<[1], [0], [0], [1], [0, 0, 1, 1], [], []>} : vector<16x4xf32>, vector<4x1xf32>, vector<16x1xf32> -> vector<16x1xf32>
    %cst_49 = arith.constant dense<0.000000e+00> : vector<4x1xf32>
    %51 = tpu.matmul %48, %50, %cst_49 {dimension_numbers = #tpu.dot_dimension_numbers<[1], [0], [0], [1], [0, 0, 1, 1], [], []>} : vector<4x16xf32>, vector<16x1xf32>, vector<4x1xf32> -> vector<4x1xf32>
    %c0_50 = arith.constant 0 : index
    %c0_51 = arith.constant 0 : index
    %52 = vector.load %arg15[%c0_50, %c0_51] : memref<4x64xf32, #tpu.memory_space<vmem>>, vector<4x64xf32>
    %c0_52 = arith.constant 0 : index
    %c0_53 = arith.constant 0 : index
    %53 = vector.load %arg13[%c0_52, %c0_53] : memref<16x1xf32, #tpu.memory_space<vmem>>, vector<16x1xf32>
    %cst_54 = arith.constant dense<0.000000e+00> : vector<64x1xf32>
    %54 = tpu.matmul %1, %53, %cst_54 {dimension_numbers = #tpu.dot_dimension_numbers<[1], [0], [0], [1], [0, 0, 1, 1], [], []>} : vector<64x16xf32>, vector<16x1xf32>, vector<64x1xf32> -> vector<64x1xf32>
    %cst_55 = arith.constant dense<0.000000e+00> : vector<4x1xf32>
    %55 = tpu.matmul %52, %54, %cst_55 {dimension_numbers = #tpu.dot_dimension_numbers<[1], [0], [0], [1], [0, 0, 1, 1], [], []>} : vector<4x64xf32>, vector<64x1xf32>, vector<4x1xf32> -> vector<4x1xf32>
    %c0_56 = arith.constant 0 : index
    %c0_57 = arith.constant 0 : index
    %56 = vector.load %arg17[%c0_56, %c0_57] : memref<64x4xf32, #tpu.memory_space<vmem>>, vector<64x4xf32>
    %c0_58 = arith.constant 0 : index
    %c0_59 = arith.constant 0 : index
    %57 = vector.load %arg18[%c0_58, %c0_59] : memref<1x16xf32, #tpu.memory_space<vmem>>, vector<1x16xf32>
    %cst_60 = arith.constant dense<0.000000e+00> : vector<4x16xf32>
    %58 = tpu.matmul %55, %57, %cst_60 {dimension_numbers = #tpu.dot_dimension_numbers<[1], [0], [0], [1], [0, 0, 1, 1], [], []>} : vector<4x1xf32>, vector<1x16xf32>, vector<4x16xf32> -> vector<4x16xf32>
    %cst_61 = arith.constant dense<0.000000e+00> : vector<64x16xf32>
    %59 = tpu.matmul %56, %58, %cst_61 {dimension_numbers = #tpu.dot_dimension_numbers<[1], [0], [0], [1], [0, 0, 1, 1], [], []>} : vector<64x4xf32>, vector<4x16xf32>, vector<64x16xf32> -> vector<64x16xf32>
    %60 = arith.subf %1, %59 : vector<64x16xf32>
    %c0_62 = arith.constant 0 : index
    %c0_63 = arith.constant 0 : index
    %61 = vector.load %arg15[%c0_62, %c0_63] : memref<4x64xf32, #tpu.memory_space<vmem>>, vector<4x64xf32>
    %62 = arith.mulf %60, %60 : vector<64x16xf32>
    %c0_64 = arith.constant 0 : index
    %c0_65 = arith.constant 0 : index
    %63 = vector.load %arg13[%c0_64, %c0_65] : memref<16x1xf32, #tpu.memory_space<vmem>>, vector<16x1xf32>
    %cst_66 = arith.constant dense<0.000000e+00> : vector<64x1xf32>
    %64 = tpu.matmul %62, %63, %cst_66 {dimension_numbers = #tpu.dot_dimension_numbers<[1], [0], [0], [1], [0, 0, 1, 1], [], []>} : vector<64x16xf32>, vector<16x1xf32>, vector<64x1xf32> -> vector<64x1xf32>
    %cst_67 = arith.constant dense<0.000000e+00> : vector<4x1xf32>
    %65 = tpu.matmul %61, %64, %cst_67 {dimension_numbers = #tpu.dot_dimension_numbers<[1], [0], [0], [1], [0, 0, 1, 1], [], []>} : vector<4x64xf32>, vector<64x1xf32>, vector<4x1xf32> -> vector<4x1xf32>
    %cst_68 = arith.constant 1.00392163 : f32
    %66 = vector.broadcast %cst_68 : f32 to vector<4x1xf32>
    %67 = arith.mulf %65, %66 : vector<4x1xf32>
    %68 = math.sqrt %67 : vector<4x1xf32>
    %cst_69 = arith.constant 1.000000e+00 : f32
    %69 = vector.broadcast %cst_69 : f32 to vector<4x1xf32>
    %70 = arith.divf %69, %68 : vector<4x1xf32>
    %c0_70 = arith.constant 0 : index
    %c0_71 = arith.constant 0 : index
    %71 = vector.load %arg17[%c0_70, %c0_71] : memref<64x4xf32, #tpu.memory_space<vmem>>, vector<64x4xf32>
    %c0_72 = arith.constant 0 : index
    %c0_73 = arith.constant 0 : index
    %72 = vector.load %arg18[%c0_72, %c0_73] : memref<1x16xf32, #tpu.memory_space<vmem>>, vector<1x16xf32>
    %cst_74 = arith.constant dense<0.000000e+00> : vector<4x16xf32>
    %73 = tpu.matmul %70, %72, %cst_74 {dimension_numbers = #tpu.dot_dimension_numbers<[1], [0], [0], [1], [0, 0, 1, 1], [], []>} : vector<4x1xf32>, vector<1x16xf32>, vector<4x16xf32> -> vector<4x16xf32>
    %cst_75 = arith.constant dense<0.000000e+00> : vector<64x16xf32>
    %74 = tpu.matmul %71, %73, %cst_75 {dimension_numbers = #tpu.dot_dimension_numbers<[1], [0], [0], [1], [0, 0, 1, 1], [], []>} : vector<64x4xf32>, vector<4x16xf32>, vector<64x16xf32> -> vector<64x16xf32>
    %c0_76 = arith.constant 0 : index
    %c0_77 = arith.constant 0 : index
    %75 = vector.load %arg17[%c0_76, %c0_77] : memref<64x4xf32, #tpu.memory_space<vmem>>, vector<64x4xf32>
    %76 = arith.mulf %51, %70 : vector<4x1xf32>
    %c0_78 = arith.constant 0 : index
    %c0_79 = arith.constant 0 : index
    %77 = vector.load %arg18[%c0_78, %c0_79] : memref<1x16xf32, #tpu.memory_space<vmem>>, vector<1x16xf32>
    %cst_80 = arith.constant dense<0.000000e+00> : vector<4x16xf32>
    %78 = tpu.matmul %76, %77, %cst_80 {dimension_numbers = #tpu.dot_dimension_numbers<[1], [0], [0], [1], [0, 0, 1, 1], [], []>} : vector<4x1xf32>, vector<1x16xf32>, vector<4x16xf32> -> vector<4x16xf32>
    %cst_81 = arith.constant dense<0.000000e+00> : vector<64x16xf32>
    %79 = tpu.matmul %75, %78, %cst_81 {dimension_numbers = #tpu.dot_dimension_numbers<[1], [0], [0], [1], [0, 0, 1, 1], [], []>} : vector<64x4xf32>, vector<4x16xf32>, vector<64x16xf32> -> vector<64x16xf32>
    %80 = arith.mulf %1, %74 : vector<64x16xf32>
    %81 = arith.subf %80, %79 : vector<64x16xf32>
    %c0_82 = arith.constant 0 : index
    %c0_83 = arith.constant 0 : index
    %82 = vector.load %arg19[%c0_82, %c0_83] : memref<8x4xf32, #tpu.memory_space<vmem>>, vector<8x4xf32>
    %cst_84 = arith.constant dense<0.000000e+00> : vector<8x1xf32>
    %83 = tpu.matmul %82, %51, %cst_84 {dimension_numbers = #tpu.dot_dimension_numbers<[1], [0], [0], [1], [0, 0, 1, 1], [], []>} : vector<8x4xf32>, vector<4x1xf32>, vector<8x1xf32> -> vector<8x1xf32>
    %c0_85 = arith.constant 0 : index
    %c0_86 = arith.constant 0 : index
    %84 = vector.load %arg20[%c0_85, %c0_86] : memref<8x4xf32, #tpu.memory_space<vmem>>, vector<8x4xf32>
    %cst_87 = arith.constant dense<0.000000e+00> : vector<8x1xf32>
    %85 = tpu.matmul %84, %68, %cst_87 {dimension_numbers = #tpu.dot_dimension_numbers<[1], [0], [0], [1], [0, 0, 1, 1], [], []>} : vector<8x4xf32>, vector<4x1xf32>, vector<8x1xf32> -> vector<8x1xf32>
    %86 = arith.addf %83, %85 : vector<8x1xf32>
    %c0_88 = arith.constant 0 : index
    %c0_89 = arith.constant 0 : index
    %87 = vector.load %arg21[%c0_88, %c0_89] : memref<8x1xf32, #tpu.memory_space<vmem>>, vector<8x1xf32>
    %88 = arith.addf %86, %87 : vector<8x1xf32>
    %c0_90 = arith.constant 0 : index
    %c0_91 = arith.constant 0 : index
    %c0_92 = arith.constant 0 : index
    %89 = vector.load %arg23[%c0_90, %c0_91, %c0_92] : memref<1x8x1xf32, #tpu.memory_space<vmem>>, vector<1x8x1xf32>
    %90 = vector.shape_cast %89 : vector<1x8x1xf32> to vector<8x1xf32>
    %91 = vector.shape_cast %88 : vector<8x1xf32> to vector<1x8x1xf32>
    tpu.vector_store %arg23[%c0_90, %c0_91, %c0_92], %91 {strides = array<i32>} : memref<1x8x1xf32, #tpu.memory_space<vmem>>, vector<1x8x1xf32>,
    %c0_93 = arith.constant 0 : index
    %c0_94 = arith.constant 0 : index
    %c0_95 = arith.constant 0 : index
    %92 = vector.load %arg8[%c0_93, %c0_94, %c0_95] : memref<3x16x16xf32, #tpu.memory_space<vmem>>, vector<1x16x16xf32>
    %93 = vector.shape_cast %92 : vector<1x16x16xf32> to vector<16x16xf32>
    %cst_96 = arith.constant dense<0.000000e+00> : vector<64x16xf32>
    %94 = tpu.matmul %81, %93, %cst_96 {dimension_numbers = #tpu.dot_dimension_numbers<[1], [0], [0], [1], [0, 0, 1, 1], [], []>} : vector<64x16xf32>, vector<16x16xf32>, vector<64x16xf32> -> vector<64x16xf32>
    %c1_97 = arith.constant 1 : index
    %c0_98 = arith.constant 0 : index
    %c0_99 = arith.constant 0 : index
    %95 = vector.load %arg8[%c1_97, %c0_98, %c0_99] : memref<3x16x16xf32, #tpu.memory_space<vmem>>, vector<1x16x16xf32>
    %96 = vector.shape_cast %95 : vector<1x16x16xf32> to vector<16x16xf32>
    %cst_100 = arith.constant dense<0.000000e+00> : vector<64x16xf32>
    %97 = tpu.matmul %81, %96, %cst_100 {dimension_numbers = #tpu.dot_dimension_numbers<[1], [0], [0], [1], [0, 0, 1, 1], [], []>} : vector<64x16xf32>, vector<16x16xf32>, vector<64x16xf32> -> vector<64x16xf32>
    %c2_101 = arith.constant 2 : index
    %c0_102 = arith.constant 0 : index
    %c0_103 = arith.constant 0 : index
    %98 = vector.load %arg8[%c2_101, %c0_102, %c0_103] : memref<3x16x16xf32, #tpu.memory_space<vmem>>, vector<1x16x16xf32>
    %99 = vector.shape_cast %98 : vector<1x16x16xf32> to vector<16x16xf32>
    %cst_104 = arith.constant dense<0.000000e+00> : vector<64x16xf32>
    %100 = tpu.matmul %81, %99, %cst_104 {dimension_numbers = #tpu.dot_dimension_numbers<[1], [0], [0], [1], [0, 0, 1, 1], [], []>} : vector<64x16xf32>, vector<16x16xf32>, vector<64x16xf32> -> vector<64x16xf32>
    %101 = tpu.concatenate %94, %97, %100 in 0 : vector<64x16xf32>, vector<64x16xf32>, vector<64x16xf32> -> vector<192x16xf32>
    %c0_105 = arith.constant 0 : index
    %c0_106 = arith.constant 0 : index
    %102 = vector.load %arg9[%c0_105, %c0_106] : memref<64x192xf32, #tpu.memory_space<vmem>>, vector<64x192xf32>
    %cst_107 = arith.constant dense<0.000000e+00> : vector<64x16xf32>
    %103 = tpu.matmul %102, %101, %cst_107 {dimension_numbers = #tpu.dot_dimension_numbers<[1], [0], [0], [1], [0, 0, 1, 1], [], []>} : vector<64x192xf32>, vector<192x16xf32>, vector<64x16xf32> -> vector<64x16xf32>
    %c0_108 = arith.constant 0 : index
    %c0_109 = arith.constant 0 : index
    %104 = vector.load %arg10[%c0_108, %c0_109] : memref<64x1xf32, #tpu.memory_space<vmem>>, vector<64x1xf32>
    %105 = vector.broadcast %104 : vector<64x1xf32> to vector<64x16xf32>
    %106 = arith.addf %103, %105 : vector<64x16xf32>
    %cst_110 = arith.constant 0.000000e+00 : f32
    %107 = vector.broadcast %cst_110 : f32 to vector<64x16xf32>
    %108 = arith.cmpf oge, %106, %107 : vector<64x16xf32>
    %cst_111 = arith.constant 1.000000e-01 : f32
    %109 = vector.broadcast %cst_111 : f32 to vector<64x16xf32>
    %110 = arith.mulf %109, %106 : vector<64x16xf32>
    %111 = arith.select %108, %106, %110 : vector<64x16xi1>, vector<64x16xf32>
    %c0_112 = arith.constant 0 : index
    %c0_113 = arith.constant 0 : index
    %c0_114 = arith.constant 0 : index
    %112 = vector.load %arg8[%c0_112, %c0_113, %c0_114] : memref<3x16x16xf32, #tpu.memory_space<vmem>>, vector<1x16x16xf32>
    %113 = vector.shape_cast %112 : vector<1x16x16xf32> to vector<16x16xf32>
    %cst_115 = arith.constant dense<0.000000e+00> : vector<64x16xf32>
    %114 = tpu.matmul %111, %113, %cst_115 {dimension_numbers = #tpu.dot_dimension_numbers<[1], [0], [0], [1], [0, 0, 1, 1], [], []>} : vector<64x16xf32>, vector<16x16xf32>, vector<64x16xf32> -> vector<64x16xf32>
    %c1_116 = arith.constant 1 : index
    %c0_117 = arith.constant 0 : index
    %c0_118 = arith.constant 0 : index
    %115 = vector.load %arg8[%c1_116, %c0_117, %c0_118] : memref<3x16x16xf32, #tpu.memory_space<vmem>>, vector<1x16x16xf32>
    %116 = vector.shape_cast %115 : vector<1x16x16xf32> to vector<16x16xf32>
    %cst_119 = arith.constant dense<0.000000e+00> : vector<64x16xf32>
    %117 = tpu.matmul %111, %116, %cst_119 {dimension_numbers = #tpu.dot_dimension_numbers<[1], [0], [0], [1], [0, 0, 1, 1], [], []>} : vector<64x16xf32>, vector<16x16xf32>, vector<64x16xf32> -> vector<64x16xf32>
    %c2_120 = arith.constant 2 : index
    %c0_121 = arith.constant 0 : index
    %c0_122 = arith.constant 0 : index
    %118 = vector.load %arg8[%c2_120, %c0_121, %c0_122] : memref<3x16x16xf32, #tpu.memory_space<vmem>>, vector<1x16x16xf32>
    %119 = vector.shape_cast %118 : vector<1x16x16xf32> to vector<16x16xf32>
    %cst_123 = arith.constant dense<0.000000e+00> : vector<64x16xf32>
    %120 = tpu.matmul %111, %119, %cst_123 {dimension_numbers = #tpu.dot_dimension_numbers<[1], [0], [0], [1], [0, 0, 1, 1], [], []>} : vector<64x16xf32>, vector<16x16xf32>, vector<64x16xf32> -> vector<64x16xf32>
    %121 = tpu.concatenate %114, %117, %120 in 0 : vector<64x16xf32>, vector<64x16xf32>, vector<64x16xf32> -> vector<192x16xf32>
    %c0_124 = arith.constant 0 : index
    %c0_125 = arith.constant 0 : index
    %122 = vector.load %arg11[%c0_124, %c0_125] : memref<16x192xf32, #tpu.memory_space<vmem>>, vector<16x192xf32>
    %cst_126 = arith.constant dense<0.000000e+00> : vector<16x16xf32>
    %123 = tpu.matmul %122, %121, %cst_126 {dimension_numbers = #tpu.dot_dimension_numbers<[1], [0], [0], [1], [0, 0, 1, 1], [], []>} : vector<16x192xf32>, vector<192x16xf32>, vector<16x16xf32> -> vector<16x16xf32>
    %c0_127 = arith.constant 0 : index
    %c0_128 = arith.constant 0 : index
    %124 = vector.load %arg12[%c0_127, %c0_128] : memref<16x1xf32, #tpu.memory_space<vmem>>, vector<16x1xf32>
    %125 = vector.broadcast %124 : vector<16x1xf32> to vector<16x16xf32>
    %126 = arith.addf %123, %125 : vector<16x16xf32>
    %cst_129 = arith.constant 0.000000e+00 : f32
    %127 = vector.broadcast %cst_129 : f32 to vector<16x16xf32>
    %128 = arith.cmpf oge, %126, %127 : vector<16x16xf32>
    %cst_130 = arith.constant 1.000000e-01 : f32
    %129 = vector.broadcast %cst_130 : f32 to vector<16x16xf32>
    %130 = arith.mulf %129, %126 : vector<16x16xf32>
    %131 = arith.select %128, %126, %130 : vector<16x16xi1>, vector<16x16xf32>
    %c0_131 = arith.constant 0 : index
    %c0_132 = arith.constant 0 : index
    %c0_133 = arith.constant 0 : index
    %132 = vector.load %arg22[%c0_131, %c0_132, %c0_133] : memref<1x16x16xf32, #tpu.memory_space<vmem>>, vector<1x16x16xf32>
    %133 = vector.shape_cast %132 : vector<1x16x16xf32> to vector<16x16xf32>
    %134 = vector.shape_cast %131 : vector<16x16xf32> to vector<1x16x16xf32>
    tpu.vector_store %arg22[%c0_131, %c0_132, %c0_133], %134 {strides = array<i32>} : memref<1x16x16xf32, #tpu.memory_space<vmem>>, vector<1x16x16xf32>,
    return
  }
  func.func @transform_0(%arg0: i32) -> (i32, i32, i32) {
    %c0_i32 = arith.constant 0 : i32
    %c0_i32_0 = arith.constant 0 : i32
    %c0_i32_1 = arith.constant 0 : i32
    return %arg0, %c0_i32, %c0_i32_0 : i32, i32, i32
  }
  func.func @transform_1(%arg0: i32) -> (i32, i32, i32) {
    %c0_i32 = arith.constant 0 : i32
    %c0_i32_0 = arith.constant 0 : i32
    %c0_i32_1 = arith.constant 0 : i32
    %c0_i32_2 = arith.constant 0 : i32
    return %c0_i32, %c0_i32_0, %c0_i32_1 : i32, i32, i32
  }
  func.func @transform_2(%arg0: i32) -> (i32, i32) {
    %c0_i32 = arith.constant 0 : i32
    %c0_i32_0 = arith.constant 0 : i32
    %c0_i32_1 = arith.constant 0 : i32
    return %c0_i32, %c0_i32_0 : i32, i32
  }
  func.func @transform_3(%arg0: i32) -> (i32, i32) {
    %c0_i32 = arith.constant 0 : i32
    %c0_i32_0 = arith.constant 0 : i32
    %c0_i32_1 = arith.constant 0 : i32
    return %c0_i32, %c0_i32_0 : i32, i32
  }
  func.func @transform_4(%arg0: i32) -> (i32, i32, i32) {
    %c0_i32 = arith.constant 0 : i32
    %c0_i32_0 = arith.constant 0 : i32
    %c0_i32_1 = arith.constant 0 : i32
    %c0_i32_2 = arith.constant 0 : i32
    return %c0_i32, %c0_i32_0, %c0_i32_1 : i32, i32, i32
  }
  func.func @transform_5(%arg0: i32) -> (i32, i32) {
    %c0_i32 = arith.constant 0 : i32
    %c0_i32_0 = arith.constant 0 : i32
    %c0_i32_1 = arith.constant 0 : i32
    return %c0_i32, %c0_i32_0 : i32, i32
  }
  func.func @transform_6(%arg0: i32) -> (i32, i32) {
    %c0_i32 = arith.constant 0 : i32
    %c0_i32_0 = arith.constant 0 : i32
    %c0_i32_1 = arith.constant 0 : i32
    return %c0_i32, %c0_i32_0 : i32, i32
  }
  func.func @transform_7(%arg0: i32) -> (i32, i32, i32) {
    %c0_i32 = arith.constant 0 : i32
    %c0_i32_0 = arith.constant 0 : i32
    %c0_i32_1 = arith.constant 0 : i32
    %c0_i32_2 = arith.constant 0 : i32
    return %c0_i32, %c0_i32_0, %c0_i32_1 : i32, i32, i32
  }
  func.func @transform_8(%arg0: i32) -> (i32, i32) {
    %c0_i32 = arith.constant 0 : i32
    %c0_i32_0 = arith.constant 0 : i32
    %c0_i32_1 = arith.constant 0 : i32
    return %c0_i32, %c0_i32_0 : i32, i32
  }
  func.func @transform_9(%arg0: i32) -> (i32, i32) {
    %c0_i32 = arith.constant 0 : i32
    %c0_i32_0 = arith.constant 0 : i32
    %c0_i32_1 = arith.constant 0 : i32
    return %c0_i32, %c0_i32_0 : i32, i32
  }
  func.func @transform_10(%arg0: i32) -> (i32, i32) {
    %c0_i32 = arith.constant 0 : i32
    %c0_i32_0 = arith.constant 0 : i32
    %c0_i32_1 = arith.constant 0 : i32
    return %c0_i32, %c0_i32_0 : i32, i32
  }
  func.func @transform_11(%arg0: i32) -> (i32, i32) {
    %c0_i32 = arith.constant 0 : i32
    %c0_i32_0 = arith.constant 0 : i32
    %c0_i32_1 = arith.constant 0 : i32
    return %c0_i32, %c0_i32_0 : i32, i32
  }
  func.func @transform_12(%arg0: i32) -> (i32, i32) {
    %c0_i32 = arith.constant 0 : i32
    %c0_i32_0 = arith.constant 0 : i32
    %c0_i32_1 = arith.constant 0 : i32
    return %c0_i32, %c0_i32_0 : i32, i32
  }
  func.func @transform_13(%arg0: i32) -> (i32, i32) {
    %c0_i32 = arith.constant 0 : i32
    %c0_i32_0 = arith.constant 0 : i32
    %c0_i32_1 = arith.constant 0 : i32
    return %c0_i32, %c0_i32_0 : i32, i32
  }
  func.func @transform_14(%arg0: i32) -> (i32, i32) {
    %c0_i32 = arith.constant 0 : i32
    %c0_i32_0 = arith.constant 0 : i32
    %c0_i32_1 = arith.constant 0 : i32
    return %c0_i32, %c0_i32_0 : i32, i32
  }
  func.func @transform_15(%arg0: i32) -> (i32, i32) {
    %c0_i32 = arith.constant 0 : i32
    %c0_i32_0 = arith.constant 0 : i32
    %c0_i32_1 = arith.constant 0 : i32
    return %c0_i32, %c0_i32_0 : i32, i32
  }
  func.func @transform_16(%arg0: i32) -> (i32, i32) {
    %c0_i32 = arith.constant 0 : i32
    %c0_i32_0 = arith.constant 0 : i32
    %c0_i32_1 = arith.constant 0 : i32
    return %c0_i32, %c0_i32_0 : i32, i32
  }
  func.func @transform_17(%arg0: i32) -> (i32, i32) {
    %c0_i32 = arith.constant 0 : i32
    %c0_i32_0 = arith.constant 0 : i32
    %c0_i32_1 = arith.constant 0 : i32
    return %c0_i32, %c0_i32_0 : i32, i32
  }
  func.func @transform_18(%arg0: i32) -> (i32, i32) {
    %c0_i32 = arith.constant 0 : i32
    %c0_i32_0 = arith.constant 0 : i32
    %c0_i32_1 = arith.constant 0 : i32
    return %c0_i32, %c0_i32_0 : i32, i32
  }
  func.func @transform_19(%arg0: i32) -> (i32, i32) {
    %c0_i32 = arith.constant 0 : i32
    %c0_i32_0 = arith.constant 0 : i32
    %c0_i32_1 = arith.constant 0 : i32
    return %c0_i32, %c0_i32_0 : i32, i32
  }
  func.func @transform_20(%arg0: i32) -> (i32, i32) {
    %c0_i32 = arith.constant 0 : i32
    %c0_i32_0 = arith.constant 0 : i32
    %c0_i32_1 = arith.constant 0 : i32
    return %c0_i32, %c0_i32_0 : i32, i32
  }
  func.func @transform_21(%arg0: i32) -> (i32, i32, i32) {
    %c0_i32 = arith.constant 0 : i32
    %c0_i32_0 = arith.constant 0 : i32
    %c0_i32_1 = arith.constant 0 : i32
    return %arg0, %c0_i32, %c0_i32_0 : i32, i32, i32
  }
  func.func @transform_22(%arg0: i32) -> (i32, i32, i32) {
    %c0_i32 = arith.constant 0 : i32
    %c0_i32_0 = arith.constant 0 : i32
    %c0_i32_1 = arith.constant 0 : i32
    return %arg0, %c0_i32, %c0_i32_0 : i32, i32, i32
  }
}

</mosaic_0001>

<bundles_post_ra>
// kernel: idn_forward.1
= control target key start
LH: loop header
LB: loop body
LE: loop exit
PB: predicated region body
PF: predicated region fallthrough
CT: control target
= control target key end

     0   :  { %s6409_s0 = inlined_call_operand.vmem [shape: f32[2,64,16], index: 0, kind: input, shape index: {}]   ;;  %s6410_s1 = inlined_call_operand.vmem [shape: f32[4,16,8], index: 1, kind: input, shape index: {}]   ;;  %s6411_s2 = inlined_call_operand.vmem [shape: f32[32,256], index: 2, kind: input, shape index: {}]   ;;  %s6412_s3 = inlined_call_operand.vmem [shape: f32[32,1], index: 3, kind: input, shape index: {}]   ;;  %s6413_s4 = inlined_call_operand.vmem [shape: f32[4,8,4], index: 4, kind: input, shape index: {}]   ;;  %s6414_s5 = inlined_call_operand.hbm [shape: f32[16,128], index: 5, kind: input, shape index: {}]   ;;  %s6415_s6 = inlined_call_operand.vmem [shape: f32[16,1], index: 6, kind: input, shape index: {}]   ;;  %s6416_s7 = inlined_call_operand.vmem [shape: f32[3,16,16], index: 7, kind: input, shape index: {}]   ;;  %s6417_s8 = inlined_call_operand.vmem [shape: f32[64,192], index: 8, kind: input, shape index: {}]   ;;  %s6418_s9 = inlined_call_operand.vmem [shape: f32[64,1], index: 9, kind: input, shape index: {}]   ;;  %s6419_s10 = inlined_call_operand.vmem [shape: f32[16,192], index: 10, kind: input, shape index: {}]   ;;  %s6420_s11 = inlined_call_operand.vmem [shape: f32[16,1], index: 11, kind: input, shape index: {}]   ;;  %s6421_s12 = inlined_call_operand.vmem [shape: f32[16,1], index: 12, kind: input, shape index: {}]   ;;  %s6422_s13 = inlined_call_operand.vmem [shape: f32[4,1], index: 13, kind: input, shape index: {}]   ;;  %s6423_s14 = inlined_call_operand.vmem [shape: f32[4,64], index: 14, kind: input, shape index: {}]   ;;  %s6424_s15 = inlined_call_operand.vmem [shape: f32[4,16], index: 15, kind: input, shape index: {}]   ;;  %s6425_s16 = inlined_call_operand.vmem [shape: f32[64,4], index: 16, kind: input, shape index: {}]   ;;  %s6426_s17 = inlined_call_operand.hbm [shape: f32[1,16], index: 17, kind: input, shape index: {}]   ;;  %s6427_s18 = inlined_call_operand.vmem [shape: f32[8,4], index: 18, kind: input, shape index: {}]   ;;  %s6428_s19 = inlined_call_operand.vmem [shape: f32[8,4], index: 19, kind: input, shape index: {}]   ;;  %s6429_s20 = inlined_call_operand.vmem [shape: f32[8,1], index: 20, kind: input, shape index: {}]   ;;  %s6430_s21 = inlined_call_operand.hbm [shape: f32[2,16,16], index: 21, kind: output, shape index: {0}]   ;;  %s6431_s22 = inlined_call_operand.vmem [shape: f32[2,8,1], index: 22, kind: output, shape index: {1}]  }
   0x1   :  { %6454 = sst [smem:[#allocation19_spill]] %s6409_s0 }
   0x2   :  { %6455 = sst [smem:[#allocation20_spill]] %s6410_s1 }
   0x3   :  { %6456 = sst [smem:[#allocation21_spill]] %s6411_s2 }
   0x4   :  { %6457 = sst [smem:[#allocation22_spill]] %s6412_s3 }
   0x5   :  { %6458 = sst [smem:[#allocation23_spill]] %s6413_s4 }
   0x6   :  { %6459 = sst [smem:[#allocation24_spill]] %s6414_s5 }
   0x7   :  { %6460 = sst [smem:[#allocation25_spill]] %s6415_s6 }
   0x8   :  { %6461 = sst [smem:[#allocation26_spill]] %s6416_s7 }
   0x9   :  { %6462 = sst [smem:[#allocation27_spill]] %s6419_s10 }
   0xa   :  { %6463 = sst [smem:[#allocation28_spill]] %s6426_s17 }
   0xb   :  { %6464 = sst [smem:[#allocation29_spill]] %s6430_s21 }
   0xc   :  { %28 = vsyncpa [#allocation3], 0 }
   0xd   :  { %29 = vsyncpa [#allocation6], 0 }
   0xe   :  { %30 = vsyncpa [#allocation4], 0 }
   0xf   :  { %32 = vsyncpa [#allocation4 + $0x1], 0  ;;  %s5608_s3 = smov 0   ;;  %s5610_s28 = smov 0  }
  0x10   :  { %s5612_s29 = smov 0   ;;  %s5614_s30 = smov 0  }
  0x11 LB: > { %6465 = sst [smem:[#allocation11_spill]] %s5468_s3  ;;  %s5629_s4 = sadd.s32 4294967295, %s5480_s30   ;;  %s5480_s30 = sphi %s5614_s30, %s6501_s30   ;;  %s5476_s29 = sphi %s5612_s29, %s6504_s29   ;;  %s5472_s28 = sphi %s5610_s28, %s6503_s28   ;;  %s5468_s3 = sphi %s5608_s3, %s6502_s3  }
  0x12   : > { %6466 = sst [smem:[#allocation12_spill]] %s5472_s28  ;;  %s4229_s0 = sadd.s32 4294967294, %s5480_s30  }
  0x13   : > { %6467 = sst [smem:[#allocation13_spill]] %s5476_s29  ;;  %s5633_s23 = sadd.s32 1, %s5480_s30  }
  0x14   : > { %6468 = sst [smem:[#allocation14_spill]] %s5480_s30  ;;  %s491_s1 = sadd.s32 1, %s5476_s29 }
  0x15   : > { %6469 = sst [smem:[#allocation15_spill]] %s5633_s23  ;;  %s488_s5 = ssub.s32 %s5480_s30, %s5633_s23 }
  0x16   : > { %p501_p0 = scmp.ne.s32.totalorder %s5476_s29, %s5472_s28  ;;  %p489_p1 = scmp.eq.s32.totalorder %s488_s5, 0 }
  0x17   : > { %p502_p2 = scmp.eq.s32.totalorder %s5629_s4, 1  ;;  %p507_p3 = scmp.ne.s32.totalorder %s5472_s28, %s5468_s3 }
  0x18   : > { %p508_p4 = scmp.eq.s32.totalorder %s4229_s0, 1  ;;  %p4230_p7 = scmp.ge.s32.totalorder %s5480_s30, 1 }
  0x19   : > { %s5644_s24 = scalar_select %p489_p1, %s5476_s29, %s491_s1  }
  0x1a   : > { %p5646_p5 = por %p502_p2, %p501_p0  ;;  %p5650_p6 = por %p508_p4, %p507_p3 }
  0x1b   : > { %6470 = sst [smem:[#allocation16_spill]] %s5644_s24  ;;  %p541_p8 = scmp.lt.s32.totalorder %s5480_s30, 3 }
  0x1c   : > { %s6471_s6 = scalar_select %p5646_p5, 1, 0 }
  0x1d   : > { %s6473_s25 = scalar_select %p5650_p6, 1, 0 }
  0x1e   : > { %6472 = sst [smem:[#allocation17_spill]] %s6471_s6  ;;  %p6445_p9 = scmp.eq.s32.totalorder %s5629_s4, 0 }
  0x1f   : > { %6474 = sst [smem:[#allocation18_spill]] %s6473_s25  ;;  %p5657_p10 = pnand %p4230_p7, %p541_p8 }
  0x20   : > { %s5482_s2 = smov [#allocation2]   ;;  %s5483_s1 = smov [#allocation5]  }
  0x21   : > { %s6475_s26 = scalar_select %p5657_p10, 1, 0 }
  0x22   : > { %s565_s27 = sshll.u32 %s5482_s2, 4  ;;  %p5288_p11 = pneg %p5657_p10  ;;  %s566_s27 = int_to_ptr.vmem [resolvable:$true] %s565_s27 }
  0x23   : > { %s612_s5 = sshll.u32 %s5483_s1, 4  ;;  %s6477_s23 = sld [smem:[#allocation24_spill]]  ;;  %s5669_s5 = int_to_ptr.vmem [resolvable:$true] %s612_s5 }
  0x24   : > { %p5665_p12 = pnand %p6445_p9, %p5288_p11 }
  0x26   : > { %p5356_p0 = pneg %p5665_p12 }
  0x29   : > { %s5354_s25 = scalar_lea.hbm %s6477_s23, 256 }
  0x2a   : > { %p5355_p13 = scmp.ne.s32.totalorder %s6477_s23, %s5354_s25  ;;  %p5361_p3 = scmp.lt.u32.totalorder %s5354_s25, %s6477_s23 }
  0x2c   : > { %p5357_p1 = pnand %p5356_p0, %p5355_p13 }
  0x2e   : > { %p5358_p2 = pneg %p5357_p1 }
  0x30   : > { %p5363_p4 = pnand %p5361_p3, %p5358_p2 }
  0x32   : > { %5366 = shalt.err (!%p5363_p4)
}
  0x33   : > { %s5367_s1 = scalar_lea.vmem %s566_s27, 256  ;;  %p5375_p9 = scmp.lt.s32.totalorder %s566_s27, %s566_s27 }
  0x34   : > { %p5368_p7 = scmp.ne.s32.totalorder %s566_s27, %s5367_s1  ;;  %p5376_p6 = scmp.lt.s32.totalorder %s5367_s1, %s5367_s1 }
  0x36   : > { %p5370_p8 = pnand %p5368_p7, %p5356_p0  ;;  %p5377_p5 = por %p5376_p6, %p5375_p9 }
  0x38   : > { %p5371_p11 = pneg %p5370_p8 }
  0x3a   : > { %p5378_p10 = pnand %p5377_p5, %p5371_p11 }
  0x3c   : > { %5381 = shalt.err (!%p5378_p10)
}
  0x3d   : > { %s5484_s3 = smov 128   ;;  %s5485_s29 = smov 8  }
  0x3e   : > { %5291 = dma.hbm_to_vmem [thread:$0]  (!%p5665_p12), %s6477_s23, 256, %s566_s27, [#allocation3], %s5484_s3, %s5484_s3, %s5485_s29  }
  0x3f   : > { %s6478_s17 = sld [smem:[#allocation28_spill]] }
  0x45   : > { %s5382_s2 = scalar_lea.hbm %s6478_s17, 16 }
  0x46   : > { %p5383_p13 = scmp.ne.s32.totalorder %s6478_s17, %s5382_s2  ;;  %p5389_p9 = scmp.lt.u32.totalorder %s5382_s2, %s6478_s17 }
  0x48   : > { %p5385_p5 = pnand %p5383_p13, %p5356_p0 }
  0x4a   : > { %p5386_p6 = pneg %p5385_p5 }
  0x4c   : > { %p5391_p10 = pnand %p5389_p9, %p5386_p6 }
  0x4e   : > { %5394 = shalt.err (!%p5391_p10)
}
  0x4f   : > { %s5395_s27 = scalar_lea.vmem %s5669_s5, 16  ;;  %s5402_s28 = scalar_lea.vmem %s5669_s5, 32 }
  0x50   : > { %p5396_p1 = scmp.ne.s32.totalorder %s5669_s5, %s5395_s27  ;;  %p5403_p4 = scmp.lt.s32.totalorder %s5669_s5, %s5669_s5 }
  0x51   : > { %p5404_p7 = scmp.lt.s32.totalorder %s5402_s28, %s5395_s27 }
  0x52   : > { %p5398_p2 = pnand %p5396_p1, %p5356_p0 }
  0x53   : > { %p5405_p8 = por %p5404_p7, %p5403_p4 }
  0x54   : > { %p5399_p3 = pneg %p5398_p2 }
  0x56   : > { %p5406_p11 = pnand %p5405_p8, %p5399_p3 }
  0x58   : > { %5409 = shalt.err (!%p5406_p11)
}
  0x59   : > { %5294 = dma.hbm_to_vmem [thread:$0]  (!%p5665_p12), %s6478_s17, 16, %s5669_s5, [#allocation6]  }
  0x5a   : > { %p6479_p13 = scmp.ne.s32.totalorder %s6475_s26, 0 }
  0x5b   : > { %p6480_p0 = scmp.eq.s32.totalorder (!%p6479_p13), %s5629_s4, 0 }
  0x5c   : > { %642 = sbr.rel (%p6479_p13) target bundleno = 4079 (0xfef), region = 104 }
  0x63   : > { %5455 = dma.done.wait (%p6480_p0), [#allocation3], 256   ;;  %p6481_p5 = pmov %p6480_p0 }
  0x64   : > { %p6482_p6 = pmov %p6480_p0 }
  0x65   : > { %5457 = vsyncadd (%p6481_p5), [#allocation3], 4294967040 }
  0x66   : > { %5459 = dma.done.wait (%p6482_p6), [#allocation6], 16   ;;  %p6483_p9 = pmov %p6480_p0 }
  0x67   : > { %p712_p10 = scmp.lt.s32.totalorder %s5629_s4, 1  ;;  %s6484_s29 = sld [smem:[#allocation19_spill]]  ;;  %vm731_vm0 = vcmask 130048   ;;  %v5486_v23 = vmov 0   ;;  %v3455_v28 = vld [vmem:[%s6418_s9] sm:$0xff]  ;;  %v3456_v29 = vld [vmem:[%s6418_s9 + $0x8] sm:$0xff] }
  0x68   : > { %5461 = vsyncadd (%p6483_p9), [#allocation6], 4294967280  ;;  %s6485_s25 = sld [smem:[#allocation20_spill]]  ;;  %s6486_s10 = sld [smem:[#allocation21_spill]]  ;;  %5346 = vset.pattern.permute.xlu0 %v5486_v23  ;;  %5347 = vset.pattern.permute.xlu1 %v5486_v23  ;;  %v3457_v30 = vld [vmem:[%s6418_s9 + $0x10] sm:$0xff]  ;;  %v3458_v31 = vld [vmem:[%s6418_s9 + $0x18] sm:$0xff] }
  0x69   : > { %s5731_s0 = scalar_select %p712_p10, %s5629_s4, 1  ;;  %v3459_v32 = vld [vmem:[%s6418_s9 + $0x20] sm:$0xff]  ;;  %v3460_v33 = vld [vmem:[%s6418_s9 + $0x28] sm:$0xff]  ;;  %v3461_v34 = vld [vmem:[%s6418_s9 + $0x30] sm:$0xff]  ;;  %vm1315_vm2 = vcmask 64512   ;;  %vm1778_vm6 = vcmask 1043456  }
  0x6a   : > { %s6487_s5 = sld [smem:[#allocation22_spill]]  ;;  %s6488_s6 = sld [smem:[#allocation25_spill]]  ;;  %v3462_v35 = vld [vmem:[%s6418_s9 + $0x38] sm:$0xff]  ;;  %v3999_v36 = vld [vmem:[%s6420_s11] sm:$0xff]  ;;  %v4000_v37 = vld [vmem:[%s6420_s11 + $0x8] sm:$0xff]  ;;  %vm1771_vm9 = vcmask 31744  }
  0x6b   : > { %s4424_s26 = sshll.u32 %s5731_s0, 6  ;;  %s6489_s27 = sld [smem:[#allocation23_spill]]  ;;  %vm5488_vm10 = vmmov 0   ;;  %vm2038_vm11 = vcmask 523264   ;;  %vm2125_vm12 = vcmask 1040384   ;;  %vm2121_vm13 = vcmask 7168  }
  0x6c   : > { %s6490_s7 = sld [smem:[#allocation26_spill]]  ;;  %s6494_s2 = sld [smem:[#allocation17_spill]] }
  0x6d   : > { %s5737_s21 = scalar_lea.vmem %s6484_s29, %s4424_s26  ;;  %s6491_s29 = sld [smem:[#allocation27_spill]] }
  0x6e   : > { %v729_v0 = vld [vmem:[%s6485_s25] sm:$0xff]  ;;  %v730_v1 = vld [vmem:[%s6485_s25 + $0x8] sm:$0xff]  ;;  %v5751_v4 = vld [vmem:[%s5737_s21 + $0x30] sm:$0xff] }
  0x6f   : > { %v5746_v2 = vld [vmem:[%s5737_s21] sm:$0xff]  ;;  %v5065_v3 = vpack.c.bf16 %v730_v1, %v729_v0  ;;  %v5754_v5 = vld [vmem:[%s5737_s21 + $0x8] sm:$0xff]  ;;  %v4249_v6 = vld [vmem:[%s6485_s25 + $0x10] sm:$0xff]  ;;  %4718 = vmatprep.mubr.msk.f32.mxu1 %vm731_vm0, %v5751_v4 }
  0x70   : > { %4693 = vmatprep.mubr.msk.f32.mxu0 %vm731_vm0, %v5746_v2  ;;  %v4250_v7 = vld [vmem:[%s6485_s25 + $0x18] sm:$0xff]  ;;  %v4259_v9 = vld [vmem:[%s6485_s25 + $0x20] sm:$0xff]  ;;  %v4260_v10 = vld [vmem:[%s6485_s25 + $0x28] sm:$0xff] }
  0x71   : > { %5066 = vmatprep.subr.bf16.mxu0 %v5065_v3  ;;  %v5069_v8 = vpack.c.bf16 %v4250_v7, %v4249_v6  ;;  %v4269_v11 = vld [vmem:[%s6485_s25 + $0x30] sm:$0xff]  ;;  %v5073_v13 = vpack.c.bf16 %v4260_v10, %v4259_v9  ;;  %v4270_v14 = vld [vmem:[%s6485_s25 + $0x38] sm:$0xff]  ;;  %v5787_v17 = vld [vmem:[%s5737_s21 + $0x20] sm:$0xff] }
  0x72   : > { %5068 = vmatpush3.bf16.msra.mxu0 %v5065_v3  ;;  %v5774_v12 = vld [vmem:[%s5737_s21 + $0x10] sm:$0xff]  ;;  %v5077_v15 = vpack.c.bf16 %v4270_v14, %v4269_v11  ;;  %v5784_v16 = vld [vmem:[%s5737_s21 + $0x18] sm:$0xff]  ;;  %v5799_v19 = vld [vmem:[%s5737_s21 + $0x28] sm:$0xff]  ;;  %p6496_p1 = scmp.ne.s32.totalorder %s6494_s2, 0 }
  0x73   : > { %5070 = vmatprep.subr.bf16.mxu0 %v5069_v8  ;;  %5276 = vmatprep.subr.bf16.mxu1 %v5069_v8  ;;  %v5790_v18 = vld [vmem:[%s5737_s21 + $0x38] sm:$0xff]  ;;  %v1186_v20 = vld [vmem:[%s6486_s10 + $0x8] sm:$0xff]  ;;  %v1193_v21 = vld [vmem:[%s6487_s5] sm:$0xff]  ;;  %s6492_s24 = smov %s6491_s29 }
  0x74   : > { %5277 = vmatpush3.bf16.msra.mxu1 %v5069_v8  ;;  %v1195_v22 = vld [vmem:[%s6487_s5 + $0x10] sm:$0xff]  ;;  %1199 = vperm.xlu0 %5346, %v1193_v21   ;;  %v1194_v24 = vld [vmem:[%s6487_s5 + $0x8] sm:$0xff]  ;;  %v1196_v25 = vld [vmem:[%s6487_s5 + $0x18] sm:$0xff]  ;;  %s6495_s5 = sld [smem:[#allocation29_spill]] }
  0x75   : > { %4694 = vmatmul.mubr.msk.f32.vlgmr.msra.gmra.mrb[0].mxu0 %vm731_vm0, %v5754_v5  ;;  %5078 = vmatprep.subr.bf16.mxu1 %v5077_v15  ;;  %v1676_v26 = vld [vmem:[%s6488_s6] sm:$0xff]  ;;  %v1677_v27 = vld [vmem:[%s6488_s6 + $0x8] sm:$0xff] }
  0x76   : > { %4696 = vmatprep.mubr.msk.f32.mxu0 %vm731_vm0, %v5774_v12  ;;  %5072 = vmatpush3.bf16.msra.mxu0 %v5069_v8 }
  0x77   : > { %5074 = vmatprep.subr.bf16.mxu0 %v5073_v13  ;;  %4719 = vmatmul.mubr.msk.f32.vlgmr.msra.gmra.mrb[0].mxu1 %vm731_vm0, %v5790_v18 }
  0x78   : > { %5080 = vmatpush3.bf16.msra.mxu1 %v5077_v15  ;;  %4741 = vmatprep.mubr.msk.f32.mxu1 %vm731_vm0, %v5746_v2 }
  0x79   : > { %4697 = vmatmul.mubr.msk.f32.gmra.mrb[2].mxu0 %vm731_vm0, %v5784_v16  ;;  %1209 = vperm.xlu1 %5347, %v1195_v22  }
  0x7a   : > { %4699 = vmatprep.mubr.msk.f32.mxu0 %vm731_vm0, %v5787_v17  ;;  %1204 = vperm.xlu0 %5346, %v1194_v24  }
  0x7b   : > { %4742 = vmatmul.mubr.msk.f32.vlgmr.msra.gmra.mrb[2].mxu1 %vm731_vm0, %v5754_v5 }
  0x7c   : > { %4744 = vmatprep.mubr.msk.f32.mxu1 %vm731_vm0, %v5774_v12 }
  0x7d   : > { %4700 = vmatmul.mubr.msk.f32.gmra.mrb[4].mxu0 %vm731_vm0, %v5799_v19  ;;  %1214 = vperm.xlu1 %5347, %v1196_v25  }
  0x7e   : > { %4702 = vmatprep.mubr.msk.f32.mxu0 %vm731_vm0, %v5751_v4  ;;  %1680 = vperm.xlu0 %5346, %v1676_v26  }
  0x7f   : > { %4745 = vmatmul.mubr.msk.f32.gmra.mrb[4].mxu1 %vm731_vm0, %v5784_v16 }
  0x80   : > { %4747 = vmatprep.mubr.msk.f32.mxu1 %vm731_vm0, %v5787_v17 }
  0x81   : > { %4703 = vmatmul.mubr.msk.f32.gmra.mrb[6].mxu0 %vm731_vm0, %v5790_v18  ;;  %1685 = vperm.xlu1 %5347, %v1677_v27  }
  0x82   : > { %4709 = vmatprep.mubr.msk.f32.mxu0 %vm731_vm0, %v5746_v2  ;;  %3465 = vperm.xlu0 %5346, %v3455_v28  }
  0x83   : > { %4748 = vmatmul.mubr.msk.f32.gmra.mrb[6].mxu1 %vm731_vm0, %v5799_v19 }
  0x84   : > { %4750 = vmatprep.mubr.msk.f32.mxu1 %vm731_vm0, %v5751_v4 }
  0x85   : > { %4710 = vmatmul.mubr.msk.f32.vlgmr.msra.gmra.mrb[8].mxu0 %vm731_vm0, %v5754_v5  ;;  %3470 = vperm.xlu1 %5347, %v3456_v29  }
  0x86   : > { %4712 = vmatprep.mubr.msk.f32.mxu0 %vm731_vm0, %v5774_v12  ;;  %5076 = vmatpush3.bf16.msra.mxu0 %v5073_v13 }
  0x87   : > { %4751 = vmatmul.mubr.msk.f32.gmra.mrb[8].mxu1 %vm731_vm0, %v5790_v18  ;;  %3475 = vperm.xlu0 %5346, %v3457_v30   ;;  %v1185_v30 = vld [vmem:[%s6486_s10] sm:$0xff] }
  0x89   : > { %4713 = vmatmul.mubr.msk.f32.gmra.mrb[10].mxu0 %vm731_vm0, %v5784_v16  ;;  %3480 = vperm.xlu1 %5347, %v3458_v31   ;;  %v1188_v31 = vld [vmem:[%s6486_s10 + $0x18] sm:$0xff] }
  0x8a   : > { %4715 = vmatprep.mubr.msk.f32.mxu0 %vm731_vm0, %v5787_v17 }
  0x8b   : > { %3485 = vperm.xlu0 %5346, %v3459_v32   ;;  %v1187_v32 = vld [vmem:[%s6486_s10 + $0x10] sm:$0xff] }
  0x8d   : > { %4716 = vmatmul.mubr.msk.f32.gmra.mrb[12].mxu0 %vm731_vm0, %v5799_v19  ;;  %3490 = vperm.xlu1 %5347, %v3460_v33   ;;  %v1190_v33 = vld [vmem:[%s6486_s10 + $0x28] sm:$0xff] }
  0x8e   : > { %4725 = vmatprep.mubr.msk.f32.mxu0 %vm731_vm0, %v5746_v2 }
  0x8f   : > { %3495 = vperm.xlu0 %5346, %v3461_v34   ;;  %v1189_v34 = vld [vmem:[%s6486_s10 + $0x20] sm:$0xff] }
  0x91   : > { %4726 = vmatmul.mubr.msk.f32.vlgmr.msra.gmra.mrb[14].mxu0 %vm731_vm0, %v5754_v5  ;;  %3500 = vperm.xlu1 %5347, %v3462_v35   ;;  %v1192_v35 = vld [vmem:[%s6486_s10 + $0x38] sm:$0xff] }
  0x92   : > { %4728 = vmatprep.mubr.msk.f32.mxu0 %vm731_vm0, %v5774_v12 }
  0x93   : > { %4003 = vperm.xlu0 %5346, %v3999_v36   ;;  %v1191_v36 = vld [vmem:[%s6486_s10 + $0x30] sm:$0xff] }
  0x95   : > { %4729 = vmatmul.mubr.msk.f32.gmra.mrb[16].mxu0 %vm731_vm0, %v5784_v16  ;;  %4008 = vperm.xlu1 %5347, %v4000_v37   ;;  %v1314_v37 = vld [vmem:[%s6489_s27] sm:$0xff] }
  0x96   : > { %4731 = vmatprep.mubr.msk.f32.mxu0 %vm731_vm0, %v5787_v17  ;;  %4753 = vmatprep.subr.mxu1 %v1314_v37 }
  0x97   : > { %4754 = vmatpush3.msra.mxu1 %v1314_v37 }
  0x99   : > { %4732 = vmatmul.mubr.msk.f32.gmra.mrb[18].mxu0 %vm731_vm0, %v5799_v19 }
  0x9a   : > { %4734 = vmatprep.mubr.msk.f32.mxu0 %vm731_vm0, %v5751_v4 }
  0x9d   : > { %4735 = vmatmul.mubr.msk.f32.gmra.mrb[20].mxu0 %vm731_vm0, %v5790_v18 }
  0x9e   : > { %1281 = vmatprep.mubr.f32.mxu0 %v1186_v20 }
 0x148   : > { %v4695_v38 = vpop.f32.mrb[0].mxu0 }
 0x149   : > { %v822_v39 = vpop.f32.mrb[1].mxu0 }
 0x14a   : > { %v5083_v40 = vpack.c.bf16 %v4695_v38, %v822_v39  ;;  %v4720_v41 = vpop.f32.mrb[0].mxu1  ;;  %v4283_v38 = vld [vmem:[%s6489_s27 + $0x8] sm:$0xff] }
 0x14b   : > { %v960_v43 = vpop.f32.mrb[1].mxu1  ;;  %4761 = vmatprep.subr.mxu1 %v4283_v38 }
 0x14c   : > { %v4698_v42 = vpop.f32.mrb[2].mxu0  ;;  %v5111_v45 = vpack.c.bf16 %v4720_v41, %v960_v43 }
 0x14d   : > { %v832_v44 = vpop.f32.mrb[3].mxu0 }
 0x14e   : > { %v5087_v46 = vpack.c.bf16 %v4698_v42, %v832_v44  ;;  %v4743_v47 = vpop.f32.mrb[2].mxu1 }
 0x14f   : > { %v1146_v49 = vpop.f32.mrb[3].mxu1 }
 0x150   : > { %v4701_v48 = vpop.f32.mrb[4].mxu0  ;;  %v5097_v51 = vpack.c.bf16 %v4743_v47, %v1146_v49 }
 0x151   : > { %v842_v50 = vpop.f32.mrb[5].mxu0 }
 0x152   : > { %v5091_v52 = vpack.c.bf16 %v4701_v48, %v842_v50  ;;  %v4746_v53 = vpop.f32.mrb[4].mxu1 }
 0x153   : > { %v1156_v55 = vpop.f32.mrb[5].mxu1 }
 0x154   : > { %v4704_v54 = vpop.f32.mrb[6].mxu0  ;;  %v5101_v57 = vpack.c.bf16 %v4746_v53, %v1156_v55 }
 0x155   : > { %v852_v56 = vpop.f32.mrb[7].mxu0 }
 0x156   : > { %v5095_v58 = vpack.c.bf16 %v4704_v54, %v852_v56  ;;  %v4749_v59 = vpop.f32.mrb[6].mxu1 }
 0x157   : > { %v1166_v61 = vpop.f32.mrb[7].mxu1 }
 0x158   : > { %v4711_v60 = vpop.f32.mrb[8].mxu0  ;;  %v5105_v63 = vpack.c.bf16 %v4749_v59, %v1166_v61  ;;  %v4288_v59 = vld [vmem:[%s6489_s27 + $0x10] sm:$0xff] }
 0x159   : > { %v930_v62 = vpop.f32.mrb[9].mxu0 }
 0x15a   : > { %v5099_v0 = vpack.c.bf16 %v4711_v60, %v930_v62  ;;  %v4752_v1 = vpop.f32.mrb[8].mxu1 }
 0x15b   : > { %v1176_v6 = vpop.f32.mrb[9].mxu1 }
 0x15c   : > { %v4714_v3 = vpop.f32.mrb[10].mxu0  ;;  %v5109_v8 = vpack.c.bf16 %v4752_v1, %v1176_v6 }
 0x15d   : > { %v940_v7 = vpop.f32.mrb[11].mxu0 }
 0x15e   : > { %v5103_v9 = vpack.c.bf16 %v4714_v3, %v940_v7  ;;  %v4293_v7 = vld [vmem:[%s6489_s27 + $0x18] sm:$0xff] }
 0x160   : > { %v4717_v10 = vpop.f32.mrb[12].mxu0 }
 0x161   : > { %v950_v11 = vpop.f32.mrb[13].mxu0 }
 0x162   : > { %v5107_v13 = vpack.c.bf16 %v4717_v10, %v950_v11 }
 0x164   : > { %v4727_v14 = vpop.f32.mrb[14].mxu0 }
 0x165   : > { %v1038_v15 = vpop.f32.mrb[15].mxu0 }
 0x166   : > { %v5081_v20 = vpack.c.bf16 %v4727_v14, %v1038_v15 }
 0x168   : > { %v4730_v21 = vpop.f32.mrb[16].mxu0  ;;  %5082 = vmatprep.subr.bf16.mxu0 %v5081_v20 }
 0x169   : > { %v1048_v22 = vpop.f32.mrb[17].mxu0  ;;  %5084 = vmatpush3.bf16.msra.mxu0 %v5083_v40  ;;  %v1200_v40 = vpop.permute.xlu0 %1199 }
 0x16a   : > { %v5085_v23 = vpack.c.bf16 %v4730_v21, %v1048_v22 }
 0x16c   : > { %v4733_v24 = vpop.f32.mrb[18].mxu0  ;;  %5086 = vmatprep.subr.bf16.mxu0 %v5085_v23 }
 0x16d   : > { %v1058_v25 = vpop.f32.mrb[19].mxu0  ;;  %5088 = vmatpush3.bf16.msra.mxu0 %v5087_v46  ;;  %v1205_v48 = vpop.permute.xlu0 %1204 }
 0x16e   : > { %v5089_v26 = vpack.c.bf16 %v4733_v24, %v1058_v25 }
 0x170   : > { %v4736_v27 = vpop.f32.mrb[20].mxu0  ;;  %5090 = vmatprep.subr.bf16.mxu0 %v5089_v26 }
 0x171   : > { %v1068_v28 = vpop.f32.mrb[21].mxu0  ;;  %5092 = vmatpush3.bf16.msra.mxu0 %v5091_v52  ;;  %v1210_v52 = vpop.permute.xlu1 %1209 }
 0x172   : > { %v5093_v29 = vpack.c.bf16 %v4736_v27, %v1068_v28 }
 0x174   : > { %5094 = vmatprep.subr.bf16.mxu0 %v5093_v29 }
 0x175   : > { %5096 = vmatpush3.bf16.msra.mxu0 %v5095_v58 }
 0x176   : > { %5098 = vmatprep.subr.bf16.mxu0 %v5097_v51 }
 0x179   : > { %5100 = vmatpush3.bf16.msra.mxu0 %v5099_v0 }
 0x17a   : > { %5102 = vmatprep.subr.bf16.mxu0 %v5101_v57 }
 0x17d   : > { %5104 = vmatpush3.bf16.msra.mxu0 %v5103_v9 }
 0x17e   : > { %5106 = vmatprep.subr.bf16.mxu0 %v5105_v63  ;;  %v1215_v63 = vpop.permute.xlu1 %1214 }
 0x181   : > { %5108 = vmatpush3.bf16.msra.mxu0 %v5107_v13 }
 0x182   : > { %5110 = vmatprep.subr.bf16.mxu0 %v5109_v8  ;;  %v1674_v8 = vld [vmem:[#allocation2] sm:$0xff] }
 0x185   : > { %5112 = vmatpush3.bf16.msra.mxu0 %v5111_v45 }
 0x188   : > { %1282 = vmatmul.mubr.f32.vlgmr.msra.gmra.mrb[22].mxu0 %v1185_v30 }
 0x189   : > { %1286 = vmatprep.mubr.f32.mxu0 %v1188_v31 }
 0x18c   : > { %1287 = vmatmul.mubr.f32.gmra.mrb[24].mxu0 %v1187_v32 }
 0x18d   : > { %1291 = vmatprep.mubr.f32.mxu0 %v1190_v33 }
 0x190   : > { %1292 = vmatmul.mubr.f32.gmra.mrb[26].mxu0 %v1189_v34 }
 0x191   : > { %1296 = vmatprep.mubr.f32.mxu0 %v1192_v35 }
 0x194   : > { %1297 = vmatmul.mubr.f32.gmra.mrb[28].mxu0 %v1191_v36 }
 0x195   : > { %4817 = vmatprep.mubr.f32.mxu0 %v1674_v8 }
 0x25b   : > { %v4498_v39 = vpop.f32.mrb[22].mxu0 }
 0x25c   : > { %v4499_v41 = vpop.f32.mrb[23].mxu0 }
 0x25d   : > { %v4500_v42 = vadd.f32 %v4499_v41, %v4498_v39  ;;  %v1770_v39 = vld [vmem:[%s6422_s13] sm:$0xf] }
 0x25f   : > { %v1284_v43 = vadd.f32 %v4500_v42, %v1200_v40  ;;  %v4501_v44 = vpop.f32.mrb[24].mxu0  ;;  %v1686_v40 = vpop.permute.xlu1 %1685 }
 0x260   : > { %v4502_v45 = vpop.f32.mrb[25].mxu0  ;;  %v1681_v42 = vpop.permute.xlu0 %1680 }
 0x261   : > { %v1306_v46 = vmul.f32 0.1, %v1284_v43  ;;  %v4503_v47 = vadd.f32 %v4502_v45, %v4501_v44  ;;  %vm1302_vm1 = vcmp.ge.f32.partialorder %v1284_v43, 0.0 }
 0x263   : > { %v1289_v49 = vadd.f32 %v4503_v47, %v1205_v48  ;;  %v4504_v50 = vpop.f32.mrb[26].mxu0  ;;  %v1310_v51 = vsel %vm1302_vm1, %v1284_v43, %v1306_v46 }
 0x264   : > { %v4505_v53 = vpop.f32.mrb[27].mxu0  ;;  %4755 = vmatprep.mubr.msk.f32.mxu1 %vm1315_vm2, %v1310_v51 }
 0x265   : > { %vm1303_vm3 = vcmp.ge.f32.partialorder %v1289_v49, 0.0  ;;  %v1307_v54 = vmul.f32 0.1, %v1289_v49  ;;  %v4506_v55 = vadd.f32 %v4505_v53, %v4504_v50  ;;  %v5487_v50 = vmov 0.0|0.0   ;;  %v1932_v53 = vld [vmem:[%s6421_s12 + $0x8] sm:$0xff] }
 0x267   : > { %v1311_v56 = vsel %vm1303_vm3, %v1289_v49, %v1307_v54  ;;  %v1294_v57 = vadd.f32 %v4506_v55, %v1210_v52  ;;  %v4507_v58 = vpop.f32.mrb[28].mxu0  ;;  %v1931_v52 = vld [vmem:[%s6421_s12] sm:$0xff] }
 0x268   : > { %v4508_v60 = vpop.f32.mrb[29].mxu0  ;;  %4756 = vmatmul.mubr.msk.f32.vlgmr.msra.gmra.mrb[10].mxu1 %vm1315_vm2, %v1311_v56 }
 0x269   : > { %v1308_v61 = vmul.f32 0.1, %v1294_v57  ;;  %v4509_v62 = vadd.f32 %v4508_v60, %v4507_v58  ;;  %vm1304_vm4 = vcmp.ge.f32.partialorder %v1294_v57, 0.0  ;;  %4762 = vmatpush3.msra.mxu1 %v4283_v38  ;;  %v1675_v38 = vld [vmem:[#allocation2 + $0x8] sm:$0xff]  ;;  %v1769_v58 = vld [vmem:[%s6424_s15] sm:$0xf] }
 0x26a   : > { %4769 = vmatprep.subr.mxu1 %v4288_v59 }
 0x26b   : > { %v1299_v0 = vadd.f32 %v4509_v62, %v1215_v63  ;;  %v1312_v1 = vsel %vm1304_vm4, %v1294_v57, %v1308_v61 }
 0x26c   : > { %4758 = vmatprep.mubr.msk.f32.mxu1 %vm1315_vm2, %v1312_v1 }
 0x26d   : > { %v1309_v3 = vmul.f32 0.1, %v1299_v0  ;;  %vm1305_vm5 = vcmp.ge.f32.partialorder %v1299_v0, 0.0 }
 0x26f   : > { %v1313_v6 = vsel %vm1305_vm5, %v1299_v0, %v1309_v3 }
 0x270   : > { %4759 = vmatmul.mubr.msk.f32.gmra.mrb[12].mxu1 %vm1315_vm2, %v1313_v6 }
 0x271   : > { %4763 = vmatprep.mubr.msk.f32.mxu1 %vm1315_vm2, %v1310_v51 }
 0x274   : > { %4764 = vmatmul.mubr.msk.f32.vlgmr.msra.gmra.mrb[14].mxu1 %vm1315_vm2, %v1311_v56 }
 0x275   : > { %4766 = vmatprep.mubr.msk.f32.mxu1 %vm1315_vm2, %v1312_v1  ;;  %4770 = vmatpush3.msra.mxu1 %v4288_v59 }
 0x276   : > { %4777 = vmatprep.subr.mxu1 %v4293_v7 }
 0x278   : > { %4767 = vmatmul.mubr.msk.f32.gmra.mrb[16].mxu1 %vm1315_vm2, %v1313_v6 }
 0x279   : > { %4771 = vmatprep.mubr.msk.f32.mxu1 %vm1315_vm2, %v1310_v51 }
 0x27c   : > { %4772 = vmatmul.mubr.msk.f32.vlgmr.msra.gmra.mrb[18].mxu1 %vm1315_vm2, %v1311_v56 }
 0x27d   : > { %4774 = vmatprep.mubr.msk.f32.mxu1 %vm1315_vm2, %v1312_v1  ;;  %4778 = vmatpush3.msra.mxu1 %v4293_v7 }
 0x27e   : > { %4820 = vmatprep.subr.msk.mxu1 %vm1778_vm6, %v1770_v39 }
 0x280   : > { %4775 = vmatmul.mubr.msk.f32.gmra.mrb[20].mxu1 %vm1315_vm2, %v1313_v6 }
 0x281   : > { %4779 = vmatprep.mubr.msk.f32.mxu1 %vm1315_vm2, %v1310_v51  ;;  %v5489_v51 = vmov 0.0  }
 0x284   : > { %4780 = vmatmul.mubr.msk.f32.vlgmr.msra.gmra.mrb[22].mxu1 %vm1315_vm2, %v1311_v56  ;;  %v5148_v56 = vpack.c.bf16 %v1932_v53, %v1931_v52 }
 0x285   : > { %4782 = vmatprep.mubr.msk.f32.mxu1 %vm1315_vm2, %v1312_v1  ;;  %4821 = vmatpush3.msk.msra.mxu1 %vm1778_vm6, %v1770_v39 }
 0x286   : > { %5145 = vmatprep.subr.bf16.mxu1 %v5487_v50 }
 0x288   : > { %4783 = vmatmul.mubr.msk.f32.gmra.mrb[24].mxu1 %vm1315_vm2, %v1313_v6 }
 0x33b   : > { %v4757_v9 = vpop.f32.mrb[10].mxu1 }
 0x33c   : > { %v1394_v10 = vpop.f32.mrb[11].mxu1 }
 0x33d   : > { %v5113_v11 = vpack.c.bf16 %v4757_v9, %v1394_v10 }
 0x33f   : > { %5114 = vmatprep.subr.bf16.mxu0 %v5113_v11 }
 0x340   : > { %5116 = vmatpush3.bf16.msra.mxu0 %v5113_v11 }
 0x343   : > { %v4760_v13 = vpop.f32.mrb[12].mxu1 }
 0x344   : > { %v1404_v14 = vpop.f32.mrb[13].mxu1 }
 0x345   : > { %v5117_v15 = vpack.c.bf16 %v4760_v13, %v1404_v14  ;;  %v6001_v13 = vld [vmem:[%s6423_s14] sm:$0xf]  ;;  %v6005_v14 = vld [vmem:[#allocation5] sm:$0x1] }
 0x347   : > { %v4765_v20 = vpop.f32.mrb[14].mxu1  ;;  %5118 = vmatprep.subr.bf16.mxu0 %v5117_v15 }
 0x348   : > { %v1481_v21 = vpop.f32.mrb[15].mxu1  ;;  %5120 = vmatpush3.bf16.msra.mxu0 %v5117_v15 }
 0x349   : > { %v5121_v22 = vpack.c.bf16 %v4765_v20, %v1481_v21  ;;  %v6013_v21 = vld [vmem:[%s6425_s16] sm:$0xff] }
 0x34b   : > { %v4768_v23 = vpop.f32.mrb[16].mxu1  ;;  %5122 = vmatprep.subr.bf16.mxu0 %v5121_v22 }
 0x34c   : > { %v1491_v24 = vpop.f32.mrb[17].mxu1  ;;  %5124 = vmatpush3.bf16.msra.mxu0 %v5121_v22 }
 0x34d   : > { %v5125_v25 = vpack.c.bf16 %v4768_v23, %v1491_v24  ;;  %v6020_v23 = vld [vmem:[%s6425_s16 + $0x8] sm:$0xff] }
 0x34f   : > { %v4773_v26 = vpop.f32.mrb[18].mxu1  ;;  %5126 = vmatprep.subr.bf16.mxu0 %v5125_v25 }
 0x350   : > { %v1568_v27 = vpop.f32.mrb[19].mxu1  ;;  %5128 = vmatpush3.bf16.msra.mxu0 %v5125_v25  ;;  %v6026_v25 = vld [vmem:[%s6425_s16 + $0x10] sm:$0xff] }
 0x351   : > { %v5129_v28 = vpack.c.bf16 %v4773_v26, %v1568_v27  ;;  %v6037_v26 = vld [vmem:[%s6425_s16 + $0x18] sm:$0xff]  ;;  %v6042_v27 = vld [vmem:[%s6425_s16 + $0x20] sm:$0xff] }
 0x353   : > { %v4776_v29 = vpop.f32.mrb[20].mxu1  ;;  %5130 = vmatprep.subr.bf16.mxu0 %v5129_v28 }
 0x354   : > { %v1578_v30 = vpop.f32.mrb[21].mxu1  ;;  %5132 = vmatpush3.bf16.msra.mxu0 %v5129_v28  ;;  %v6051_v28 = vld [vmem:[%s6425_s16 + $0x28] sm:$0xff] }
 0x355   : > { %v5133_v31 = vpack.c.bf16 %v4776_v29, %v1578_v30  ;;  %v6056_v29 = vld [vmem:[%s6425_s16 + $0x30] sm:$0xff]  ;;  %v6065_v30 = vld [vmem:[%s6425_s16 + $0x38] sm:$0xff] }
 0x357   : > { %v4781_v32 = vpop.f32.mrb[22].mxu1  ;;  %5134 = vmatprep.subr.bf16.mxu0 %v5133_v31 }
 0x358   : > { %v1655_v33 = vpop.f32.mrb[23].mxu1  ;;  %5136 = vmatpush3.bf16.msra.mxu0 %v5133_v31 }
 0x359   : > { %v5137_v34 = vpack.c.bf16 %v4781_v32, %v1655_v33 }
 0x35b   : > { %v4784_v35 = vpop.f32.mrb[24].mxu1  ;;  %5138 = vmatprep.subr.bf16.mxu0 %v5137_v34 }
 0x35c   : > { %v1665_v36 = vpop.f32.mrb[25].mxu1  ;;  %5140 = vmatpush3.bf16.msra.mxu0 %v5137_v34 }
 0x35d   : > { %v5141_v37 = vpack.c.bf16 %v4784_v35, %v1665_v36 }
 0x35f   : > { %5142 = vmatprep.subr.bf16.mxu0 %v5141_v37 }
 0x360   : > { %5144 = vmatpush3.bf16.msra.mxu0 %v5141_v37 }
 0x361   : > { %4867 = vmatprep.subr.mxu0 %v5489_v51 }
 0x363   : > { %4818 = vmatmul.mubr.f32.vlgmr.msra.gmra.mrb[30].mxu0 %v1675_v38 }
 0x364   : > { %4869 = vmatprep.mubr.msk.f32.mxu0 %vm5488_vm10, %v5489_v51  ;;  %4868 = vmatpush3.msk.msra.mxu0 %vm2125_vm12, %v6005_v14 }
 0x436   : > { %v4819_v41 = vpop.f32.mrb[30].mxu0 }
 0x437   : > { %v1760_v43 = vadd.f32 %v4819_v41, %v1686_v40  ;;  %v1754_v44 = vpop.f32.mrb[31].mxu0 }
 0x438   : > { %v1755_v45 = vadd.f32 %v1754_v44, %v1681_v42 }
 0x439   : > { %v1766_v46 = vmul.f32 0.1, %v1760_v43  ;;  %vm1764_vm7 = vcmp.ge.f32.partialorder %v1760_v43, 0.0 }
 0x43a   : > { %vm1763_vm8 = vcmp.ge.f32.partialorder %v1755_v45, 0.0  ;;  %v1765_v47 = vmul.f32 0.1, %v1755_v45 }
 0x43b   : > { %v1768_v49 = vsel %vm1764_vm7, %v1760_v43, %v1766_v46 }
 0x43c   : > { %v1767_v48 = vsel %vm1763_vm8, %v1755_v45, %v1765_v47 }
 0x43d   : > { %4822 = vmatprep.mubr.msk.f32.mxu1 %vm1771_vm9, %v1767_v48 }
 0x43e   : > { %4823 = vmatmul.mubr.msk.f32.vlgmr.msra.gmra.mrb[26].mxu1 %vm1771_vm9, %v1768_v49 }
 0x43f   : > { %4829 = vmatprep.mubr.msk.f32.mxu1 %vm5488_vm10, %v5489_v51 }
 0x511   : > { %v4824_v54 = vpop.f32.mrb[26].mxu1 }
 0x512   : > { %v1848_v55 = vpop.f32.mrb[27].mxu1 }
 0x513   : > { %v5146_v57 = vpack.c.bf16 %v4824_v54, %v1848_v55 }
 0x515   : > { %5147 = vmatpush3.bf16.msra.mxu1 %v5146_v57 }
 0x516   : > { %5149 = vmatprep.subr.bf16.mxu1 %v5148_v56 }
 0x518   : > { %4830 = vmatmul.mubr.msk.f32.vlgmr.msra.gmra.mrb[28].mxu1 %vm731_vm0, %v1769_v58 }
 0x519   : > { %5151 = vmatpush3.bf16.msra.mxu1 %v5148_v56  ;;  %4836 = vmatprep.mubr.msk.f32.mxu1 %vm731_vm0, %v5746_v2 }
 0x51a   : > { %5152 = vmatprep.subr.bf16.mxu1 %v5487_v50 }
 0x51c   : > { %4837 = vmatmul.mubr.msk.f32.vlgmr.msra.gmra.mrb[30].mxu1 %vm731_vm0, %v5754_v5 }
 0x51d   : > { %4839 = vmatprep.mubr.msk.f32.mxu1 %vm731_vm0, %v5774_v12 }
 0x520   : > { %4840 = vmatmul.mubr.msk.f32.gmra.mrb[32].mxu1 %vm731_vm0, %v5784_v16 }
 0x521   : > { %4842 = vmatprep.mubr.msk.f32.mxu1 %vm731_vm0, %v5787_v17 }
 0x524   : > { %4843 = vmatmul.mubr.msk.f32.gmra.mrb[34].mxu1 %vm731_vm0, %v5799_v19 }
 0x525   : > { %4845 = vmatprep.mubr.msk.f32.mxu1 %vm731_vm0, %v5751_v4 }
 0x528   : > { %4846 = vmatmul.mubr.msk.f32.gmra.mrb[36].mxu1 %vm731_vm0, %v5790_v18 }
 0x529   : > { %4864 = vmatprep.mubr.msk.f32.mxu1 %vm5488_vm10, %v5489_v51 }
 0x5eb   : > { %v5993_v59 = vpop.f32.mrb[28].mxu1 }
 0x5ec   : > { %v4831_v60 = vpop.f32.mrb[29].mxu1 }
 0x5ef   : > { %v4838_v61 = vpop.f32.mrb[30].mxu1 }
 0x5f0   : > { %v1999_v62 = vpop.f32.mrb[31].mxu1 }
 0x5f1   : > { %v5153_v63 = vpack.c.bf16 %v4838_v61, %v1999_v62 }
 0x5f3   : > { %v4841_v0 = vpop.f32.mrb[32].mxu1  ;;  %5154 = vmatpush3.bf16.msra.mxu1 %v5153_v63 }
 0x5f4   : > { %v2009_v1 = vpop.f32.mrb[33].mxu1  ;;  %5155 = vmatprep.subr.bf16.mxu1 %v5487_v50 }
 0x5f5   : > { %v5156_v3 = vpack.c.bf16 %v4841_v0, %v2009_v1 }
 0x5f7   : > { %v4844_v6 = vpop.f32.mrb[34].mxu1  ;;  %5157 = vmatpush3.bf16.msra.mxu1 %v5156_v3 }
 0x5f8   : > { %v2019_v7 = vpop.f32.mrb[35].mxu1  ;;  %5158 = vmatprep.subr.bf16.mxu1 %v5487_v50 }
 0x5f9   : > { %v5159_v8 = vpack.c.bf16 %v4844_v6, %v2019_v7 }
 0x5fb   : > { %v4847_v9 = vpop.f32.mrb[36].mxu1  ;;  %5160 = vmatpush3.bf16.msra.mxu1 %v5159_v8 }
 0x5fc   : > { %v2029_v10 = vpop.f32.mrb[37].mxu1  ;;  %5161 = vmatprep.subr.bf16.mxu1 %v5487_v50 }
 0x5fd   : > { %v5162_v11 = vpack.c.bf16 %v4847_v9, %v2029_v10 }
 0x5ff   : > { %5163 = vmatpush3.bf16.msra.mxu1 %v5162_v11 }
 0x600   : > { %5165 = vmatprep.subr.bf16.mxu1 %v5148_v56 }
 0x602   : > { %4865 = vmatmul.mubr.msk.f32.vlgmr.msra.gmra.mrb[38].mxu1 %vm2038_vm11, %v6001_v13 }
 0x603   : > { %5167 = vmatpush3.bf16.msra.mxu1 %v5148_v56 }
 0x6d5   : > { %v2108_v15 = vpop.f32.mrb[38].mxu1 }
 0x6d6   : > { %v4866_v20 = vpop.f32.mrb[39].mxu1  ;;  %4870 = vmatmul.mubr.msk.f32.vlgmr.msra.gmra.mrb[32].mxu0 %vm2121_vm13, %v2108_v15 }
 0x6d7   : > { %4874 = vmatprep.mubr.msk.f32.mxu0 %vm1771_vm9, %v6013_v21 }
 0x7a9   : > { %v2195_v22 = vpop.f32.mrb[32].mxu0 }
 0x7aa   : > { %v4871_v24 = vpop.f32.mrb[33].mxu0  ;;  %4872 = vmatprep.subr.msk.mxu0 %vm1778_vm6, %v2195_v22 }
 0x7ab   : > { %4873 = vmatpush3.msk.msra.mxu0 %vm1778_vm6, %v2195_v22 }
 0x7ac   : > { %4875 = vmatmul.mubr.msk.f32.vlgmr.msra.gmra.mrb[34].mxu0 %vm1771_vm9, %v6020_v23  ;;  %5168 = vmatprep.subr.bf16.mxu0 %v5487_v50 }
 0x7ad   : > { %4877 = vmatprep.mubr.msk.f32.mxu0 %vm1771_vm9, %v6026_v25 }
 0x7b0   : > { %4878 = vmatmul.mubr.msk.f32.gmra.mrb[36].mxu0 %vm1771_vm9, %v6037_v26 }
 0x7b1   : > { %4880 = vmatprep.mubr.msk.f32.mxu0 %vm1771_vm9, %v6042_v27 }
 0x7b4   : > { %4881 = vmatmul.mubr.msk.f32.gmra.mrb[38].mxu0 %vm1771_vm9, %v6051_v28 }
 0x7b5   : > { %4883 = vmatprep.mubr.msk.f32.mxu0 %vm1771_vm9, %v6056_v29 }
 0x7b8   : > { %4884 = vmatmul.mubr.msk.f32.gmra.mrb[40].mxu0 %vm1771_vm9, %v6065_v30 }
 0x7b9   : > { %4918 = vmatprep.mubr.msk.f32.mxu0 %vm5488_vm10, %v5489_v51 }
 0x87f   : > { %v4876_v31 = vpop.f32.mrb[34].mxu0 }
 0x880   : > { %v2332_v32 = vsub.f32 %v5754_v5, %v4876_v31  ;;  %v2292_v33 = vpop.f32.mrb[35].mxu0 }
 0x881   : > { %v2331_v34 = vsub.f32 %v5746_v2, %v2292_v33 }
 0x882   : > { %v2340_v37 = vmul.f32 %v2332_v32, %v2332_v32 }
 0x883   : > { %v2339_v35 = vmul.f32 %v2331_v34, %v2331_v34  ;;  %v4879_v36 = vpop.f32.mrb[36].mxu0 }
 0x884   : > { %v2334_v38 = vsub.f32 %v5784_v16, %v4879_v36  ;;  %v2302_v39 = vpop.f32.mrb[37].mxu0 }
 0x885   : > { %v2333_v40 = vsub.f32 %v5774_v12, %v2302_v39  ;;  %4890 = vmatprep.mubr.msk.f32.mxu1 %vm731_vm0, %v2339_v35 }
 0x886   : > { %4891 = vmatmul.mubr.msk.f32.vlgmr.msra.gmra.mrb[40].mxu1 %vm731_vm0, %v2340_v37  ;;  %v2342_v43 = vmul.f32 %v2334_v38, %v2334_v38 }
 0x887   : > { %v2341_v41 = vmul.f32 %v2333_v40, %v2333_v40  ;;  %v4882_v42 = vpop.f32.mrb[38].mxu0 }
 0x888   : > { %v2336_v44 = vsub.f32 %v5799_v19, %v4882_v42  ;;  %v2312_v45 = vpop.f32.mrb[39].mxu0 }
 0x889   : > { %v2335_v46 = vsub.f32 %v5787_v17, %v2312_v45  ;;  %4893 = vmatprep.mubr.msk.f32.mxu1 %vm731_vm0, %v2341_v41 }
 0x88a   : > { %4894 = vmatmul.mubr.msk.f32.gmra.mrb[42].mxu1 %vm731_vm0, %v2342_v43  ;;  %v2344_v49 = vmul.f32 %v2336_v44, %v2336_v44 }
 0x88b   : > { %v2343_v47 = vmul.f32 %v2335_v46, %v2335_v46  ;;  %v4885_v48 = vpop.f32.mrb[40].mxu0 }
 0x88c   : > { %v2338_v52 = vsub.f32 %v5790_v18, %v4885_v48  ;;  %v2322_v53 = vpop.f32.mrb[41].mxu0 }
 0x88d   : > { %v2337_v54 = vsub.f32 %v5751_v4, %v2322_v53  ;;  %4896 = vmatprep.mubr.msk.f32.mxu1 %vm731_vm0, %v2343_v47 }
 0x88e   : > { %4897 = vmatmul.mubr.msk.f32.gmra.mrb[44].mxu1 %vm731_vm0, %v2344_v49  ;;  %v2346_v56 = vmul.f32 %v2338_v52, %v2338_v52 }
 0x88f   : > { %v2345_v55 = vmul.f32 %v2337_v54, %v2337_v54 }
 0x891   : > { %4899 = vmatprep.mubr.msk.f32.mxu1 %vm731_vm0, %v2345_v55 }
 0x892   : > { %4900 = vmatmul.mubr.msk.f32.gmra.mrb[46].mxu1 %vm731_vm0, %v2346_v56 }
 0x893   : > { %4928 = vmatprep.mubr.msk.f32.mxu1 %vm1771_vm9, %v6013_v21 }
 0x959   : > { %v4892_v57 = vpop.f32.mrb[40].mxu1 }
 0x95a   : > { %v2437_v58 = vpop.f32.mrb[41].mxu1 }
 0x95b   : > { %v5169_v60 = vpack.c.bf16 %v4892_v57, %v2437_v58 }
 0x95d   : > { %v4895_v18 = vpop.f32.mrb[42].mxu1  ;;  %5170 = vmatpush3.bf16.msra.mxu0 %v5169_v60  ;;  %v5353_v60 = vld [vmem:[%s5737_s21 + $0x30] sm:$0xff] }
 0x95e   : > { %v2447_v61 = vpop.f32.mrb[43].mxu1  ;;  %5171 = vmatprep.subr.bf16.mxu0 %v5487_v50 }
 0x95f   : > { %v5172_v4 = vpack.c.bf16 %v4895_v18, %v2447_v61 }
 0x961   : > { %v4898_v62 = vpop.f32.mrb[44].mxu1  ;;  %5173 = vmatpush3.bf16.msra.mxu0 %v5172_v4 }
 0x962   : > { %v2457_v63 = vpop.f32.mrb[45].mxu1  ;;  %5174 = vmatprep.subr.bf16.mxu0 %v5487_v50 }
 0x963   : > { %v5175_v0 = vpack.c.bf16 %v4898_v62, %v2457_v63 }
 0x965   : > { %v4901_v1 = vpop.f32.mrb[46].mxu1  ;;  %5176 = vmatpush3.bf16.msra.mxu0 %v5175_v0 }
 0x966   : > { %v2467_v3 = vpop.f32.mrb[47].mxu1  ;;  %5177 = vmatprep.subr.bf16.mxu0 %v5487_v50 }
 0x967   : > { %v5178_v6 = vpack.c.bf16 %v4901_v1, %v2467_v3 }
 0x969   : > { %5179 = vmatpush3.bf16.msra.mxu0 %v5178_v6 }
 0x96a   : > { %4921 = vmatprep.subr.mxu0 %v5489_v51 }
 0x96c   : > { %4919 = vmatmul.mubr.msk.f32.vlgmr.msra.gmra.mrb[42].mxu0 %vm2038_vm11, %v6001_v13 }
 0x96d   : > { %4922 = vmatpush3.msk.msra.mxu0 %vm2125_vm12, %v6005_v14  ;;  %4923 = vmatprep.mubr.msk.f32.mxu0 %vm5488_vm10, %v5489_v51 }
 0x96e   : > { %4940 = vmatprep.subr.mxu0 %v5489_v51 }
 0xa3f   : > { %v2542_v7 = vpop.f32.mrb[42].mxu0 }
 0xa40   : > { %v2546_v8 = vmul.f32 1.0039216, %v2542_v7  ;;  %v4920_v9 = vpop.f32.mrb[43].mxu0 }
 0xa42   : > { %5348 = vrsqrt.f32 %v2546_v8  ;;  %vm2549_vm14 = vcmp.eq.f32.partialorder %v2546_v8, inf  ;;  %v2552_v15 = vand.u32 2147483648, %v2546_v8  ;;  %vm2551_vm15 = vcmp.eq.f32.partialorder %v2546_v8, 0.0 }
 0xa4c   : > { %v5349_v10 = vpop.eup %5348 }
 0xa4d   : > { %v2548_v11 = vmul.f32 %v5349_v10, %v2546_v8  ;;  %v3440_v10 = vld [vmem:[%s6417_s8 + $0x8] sm:$0xff] }
 0xa4f   : > { %v2550_v20 = vsel %vm2549_vm14, %v2546_v8, %v2548_v11  ;;  %v3089_v8 = vld [vmem:[%s6429_s20] sm:$0xff] }
 0xa50   : > { %v2553_v22 = vsel %vm2551_vm15, %v2552_v15, %v2550_v20 }
 0xa51   : > { %5350 = vrcp.f32 %v2553_v22 }
 0xa5b   : > { %v5351_v13 = vpop.eup %5350 }
 0xa5c   : > { %4924 = vmatmul.mubr.msk.f32.vlgmr.msra.gmra.mrb[44].mxu0 %vm2121_vm13, %v5351_v13  ;;  %v2737_v24 = vmul.f32 %v5351_v13, %v5993_v59 }
 0xa5d   : > { %4941 = vmatpush3.msk.msra.mxu0 %vm2125_vm12, %v6005_v14  ;;  %4942 = vmatprep.mubr.msk.f32.mxu0 %vm5488_vm10, %v5489_v51 }
 0xa60   : > { %4943 = vmatmul.mubr.msk.f32.vlgmr.msra.gmra.mrb[46].mxu0 %vm2121_vm13, %v2737_v24 }
 0xa61   : > { %4947 = vmatprep.mubr.msk.f32.mxu0 %vm1771_vm9, %v6013_v21  ;;  %v2936_v21 = vld [vmem:[%s6428_s19] sm:$0xff] }
 0xb2f   : > { %v2625_v31 = vpop.f32.mrb[44].mxu0 }
 0xb30   : > { %v4925_v32 = vpop.f32.mrb[45].mxu0  ;;  %4926 = vmatprep.subr.msk.mxu1 %vm1778_vm6, %v2625_v31 }
 0xb31   : > { %4927 = vmatpush3.msk.msra.mxu1 %vm1778_vm6, %v2625_v31 }
 0xb32   : > { %4929 = vmatmul.mubr.msk.f32.vlgmr.msra.gmra.mrb[48].mxu1 %vm1771_vm9, %v6020_v23  ;;  %4959 = vmatprep.subr.mxu1 %v5489_v51 }
 0xb33   : > { %v2807_v14 = vpop.f32.mrb[46].mxu0  ;;  %4960 = vmatpush3.msk.msra.mxu1 %vm1778_vm6, %v2553_v22  ;;  %4931 = vmatprep.mubr.msk.f32.mxu1 %vm1771_vm9, %v6026_v25 }
 0xb34   : > { %v4944_v33 = vpop.f32.mrb[47].mxu0  ;;  %4945 = vmatprep.subr.msk.mxu0 %vm1778_vm6, %v2807_v14  ;;  %4964 = vmatprep.subr.mxu1 %v5489_v51 }
 0xb35   : > { %4946 = vmatpush3.msk.msra.mxu0 %vm1778_vm6, %v2807_v14 }
 0xb36   : > { %4932 = vmatmul.mubr.msk.f32.gmra.mrb[50].mxu1 %vm1771_vm9, %v6037_v26  ;;  %4948 = vmatmul.mubr.msk.f32.vlgmr.msra.gmra.mrb[48].mxu0 %vm1771_vm9, %v6020_v23  ;;  %v3092_v23 = vld [vmem:[%s6490_s7] sm:$0xff] }
 0xb37   : > { %4934 = vmatprep.mubr.msk.f32.mxu1 %vm1771_vm9, %v6042_v27  ;;  %4950 = vmatprep.mubr.msk.f32.mxu0 %vm1771_vm9, %v6026_v25  ;;  %v3093_v25 = vld [vmem:[%s6490_s7 + $0x8] sm:$0xff] }
 0xb3a   : > { %4935 = vmatmul.mubr.msk.f32.gmra.mrb[52].mxu1 %vm1771_vm9, %v6051_v28  ;;  %4951 = vmatmul.mubr.msk.f32.gmra.mrb[50].mxu0 %vm1771_vm9, %v6037_v26  ;;  %v4365_v26 = vld [vmem:[%s6490_s7 + $0x10] sm:$0xff] }
 0xb3b   : > { %4937 = vmatprep.mubr.msk.f32.mxu1 %vm1771_vm9, %v6056_v29  ;;  %4953 = vmatprep.mubr.msk.f32.mxu0 %vm1771_vm9, %v6042_v27  ;;  %v6163_v27 = vpack.c.bf16 %v3093_v25, %v3092_v23 }
 0xb3d   : > { %5181 = vmatprep.subr.bf16.mxu0 %v6163_v27 }
 0xb3e   : > { %4938 = vmatmul.mubr.msk.f32.gmra.mrb[54].mxu1 %vm1771_vm9, %v6065_v30  ;;  %4954 = vmatmul.mubr.msk.f32.gmra.mrb[52].mxu0 %vm1771_vm9, %v6051_v28 }
 0xb3f   : > { %4956 = vmatprep.mubr.msk.f32.mxu0 %vm1771_vm9, %v6056_v29  ;;  %4961 = vmatprep.mubr.msk.f32.mxu1 %vm5488_vm10, %v5489_v51  ;;  %v4375_v29 = vld [vmem:[%s6490_s7 + $0x20] sm:$0xff] }
 0xb40   : > { %5183 = vmatpush3.bf16.msra.mxu0 %v6163_v27 }
 0xb42   : > { %4957 = vmatmul.mubr.msk.f32.gmra.mrb[54].mxu0 %vm1771_vm9, %v6065_v30  ;;  %4962 = vmatmul.mubr.msk.f32.vlgmr.msra.gmra.mrb[56].mxu1 %vm1771_vm9, %v2936_v21  ;;  %v4376_v30 = vld [vmem:[%s6490_s7 + $0x28] sm:$0xff] }
 0xb43   : > { %4965 = vmatpush3.msk.msra.mxu1 %vm1778_vm6, %v5993_v59  ;;  %4966 = vmatprep.mubr.msk.f32.mxu1 %vm5488_vm10, %v5489_v51  ;;  %v4366_v59 = vld [vmem:[%s6490_s7 + $0x18] sm:$0xff]  ;;  %v2935_v51 = vld [vmem:[%s6427_s18] sm:$0xff]  ;;  %v6185_v34 = vpack.c.bf16 %v4376_v30, %v4375_v29 }
 0xb44   : > { %v6171_v28 = vpack.c.bf16 %v4366_v59, %v4365_v26 }
 0xb45   : > { %5189 = vmatprep.subr.bf16.mxu0 %v6185_v34 }
 0xb46   : > { %4967 = vmatmul.mubr.msk.f32.vlgmr.msra.gmra.mrb[58].mxu1 %vm1771_vm9, %v2935_v51  ;;  %5185 = vmatprep.subr.bf16.mxu1 %v6171_v28 }
 0xb47   : > { %5187 = vmatpush3.bf16.msra.mxu1 %v6171_v28 }
 0xb48   : > { %5192 = vmatprep.subr.bf16.mxu1 %v5487_v50 }
 0xc05   : > { %v4930_v35 = vpop.f32.mrb[48].mxu1 }
 0xc06   : > { %v2920_v36 = vmul.f32 %v4930_v35, %v5754_v5  ;;  %v2698_v37 = vpop.f32.mrb[49].mxu1 }
 0xc07   : > { %v2919_v38 = vmul.f32 %v2698_v37, %v5746_v2 }
 0xc09   : > { %v4949_v39 = vpop.f32.mrb[48].mxu0  ;;  %v4933_v40 = vpop.f32.mrb[50].mxu1 }
 0xc0a   : > { %v2928_v41 = vsub.f32 %v2920_v36, %v4949_v39  ;;  %v2880_v42 = vpop.f32.mrb[49].mxu0  ;;  %v2922_v43 = vmul.f32 %v4933_v40, %v5784_v16  ;;  %v2708_v44 = vpop.f32.mrb[51].mxu1 }
 0xc0b   : > { %v2927_v45 = vsub.f32 %v2919_v38, %v2880_v42  ;;  %v2921_v46 = vmul.f32 %v2708_v44, %v5774_v12 }
 0xc0d   : > { %v4952_v47 = vpop.f32.mrb[50].mxu0  ;;  %4973 = vmatprep.mubr.msk.f32.mxu0 %vm731_vm0, %v2927_v45  ;;  %v4936_v48 = vpop.f32.mrb[52].mxu1  ;;  %4989 = vmatprep.mubr.msk.f32.mxu1 %vm731_vm0, %v2927_v45 }
 0xc0e   : > { %v2930_v5 = vsub.f32 %v2922_v43, %v4952_v47  ;;  %v2890_v49 = vpop.f32.mrb[51].mxu0  ;;  %4974 = vmatmul.mubr.msk.f32.vlgmr.msra.gmra.mrb[56].mxu0 %vm731_vm0, %v2928_v41  ;;  %v2924_v2 = vmul.f32 %v4936_v48, %v5799_v19  ;;  %v2718_v52 = vpop.f32.mrb[53].mxu1  ;;  %4990 = vmatmul.mubr.msk.f32.vlgmr.msra.gmra.mrb[60].mxu1 %vm731_vm0, %v2928_v41  ;;  %v5352_v19 = vld [vmem:[%s5737_s21 + $0x38] sm:$0xff]  ;;  %s4240_s21 = sshll.u32 %s5731_s0, 3  ;;  %s4425_s0 = sshll.u32 %s5629_s4, 8 }
 0xc0f   : > { %v2929_v16 = vsub.f32 %v2921_v46, %v2890_v49  ;;  %v2923_v12 = vmul.f32 %v2718_v52, %v5787_v17  ;;  %5191 = vmatpush3.bf16.msra.mxu0 %v6185_v34  ;;  %s720_s30 = scalar_lea.vmem %s6431_s22, %s4240_s21  ;;  %v3439_v52 = vld [vmem:[%s6417_s8] sm:$0xff]  ;;  %s6363_s28 = scalar_lea.hbm %s6495_s5, %s4425_s0 }
 0xc10   : > { %5229 = vmatprep.subr.bf16.mxu0 %v6163_v27 }
 0xc11   : > { %v4955_v53 = vpop.f32.mrb[52].mxu0  ;;  %4976 = vmatprep.mubr.msk.f32.mxu0 %vm731_vm0, %v2929_v16  ;;  %v4939_v54 = vpop.f32.mrb[54].mxu1  ;;  %4992 = vmatprep.mubr.msk.f32.mxu1 %vm731_vm0, %v2929_v16 }
 0xc12   : > { %v2932_v55 = vsub.f32 %v2924_v2, %v4955_v53  ;;  %v2900_v56 = vpop.f32.mrb[53].mxu0  ;;  %4977 = vmatmul.mubr.msk.f32.gmra.mrb[58].mxu0 %vm731_vm0, %v2930_v5  ;;  %v2926_v57 = vmul.f32 %v5352_v19, %v4939_v54  ;;  %v2728_v58 = vpop.f32.mrb[55].mxu1  ;;  %4993 = vmatmul.mubr.msk.f32.gmra.mrb[62].mxu1 %vm731_vm0, %v2930_v5  ;;  %v3444_v53 = vld [vmem:[%s6417_s8 + $0x28] sm:$0xff]  ;;  %v3443_v54 = vld [vmem:[%s6417_s8 + $0x20] sm:$0xff] }
 0xc13   : > { %v2931_v17 = vsub.f32 %v2923_v12, %v2900_v56  ;;  %v2925_v18 = vmul.f32 %v5353_v60, %v2728_v58  ;;  %v3441_v12 = vld [vmem:[%s6417_s8 + $0x10] sm:$0xff]  ;;  %v3448_v19 = vld [vmem:[%s6417_s8 + $0x48] sm:$0xff]  ;;  %v3450_v58 = vld [vmem:[%s6417_s8 + $0x58] sm:$0xff] }
 0xc14   : > { %v3445_v56 = vld [vmem:[%s6417_s8 + $0x30] sm:$0xff]  ;;  %v3452_v60 = vld [vmem:[%s6417_s8 + $0x68] sm:$0xff] }
 0xc15   : > { %v4958_v61 = vpop.f32.mrb[54].mxu0  ;;  %4979 = vmatprep.mubr.msk.f32.mxu0 %vm731_vm0, %v2931_v17  ;;  %4995 = vmatprep.mubr.msk.f32.mxu1 %vm731_vm0, %v2931_v17  ;;  %v3009_v0 = vpop.f32.mrb[56].mxu1 }
 0xc16   : > { %v2934_v4 = vsub.f32 %v2926_v57, %v4958_v61  ;;  %v2910_v62 = vpop.f32.mrb[55].mxu0  ;;  %4980 = vmatmul.mubr.msk.f32.gmra.mrb[60].mxu0 %vm731_vm0, %v2932_v55  ;;  %4996 = vmatmul.mubr.msk.f32.gmra.mrb[64].mxu1 %vm731_vm0, %v2932_v55  ;;  %v4963_v1 = vpop.f32.mrb[57].mxu1  ;;  %v3447_v57 = vld [vmem:[%s6417_s8 + $0x40] sm:$0xff]  ;;  %v3454_v61 = vld [vmem:[%s6417_s8 + $0x78] sm:$0xff] }
 0xc17   : > { %v2933_v63 = vsub.f32 %v2925_v18, %v2910_v62  ;;  %v3451_v18 = vld [vmem:[%s6417_s8 + $0x60] sm:$0xff]  ;;  %v3466_v62 = vpop.permute.xlu0 %3465 }
 0xc19   : > { %4982 = vmatprep.mubr.msk.f32.mxu0 %vm731_vm0, %v2933_v63  ;;  %4998 = vmatprep.mubr.msk.f32.mxu1 %vm731_vm0, %v2933_v63  ;;  %v3085_v3 = vpop.f32.mrb[58].mxu1 }
 0xc1a   : > { %4983 = vmatmul.mubr.msk.f32.gmra.mrb[62].mxu0 %vm731_vm0, %v2934_v4  ;;  %4999 = vmatmul.mubr.msk.f32.gmra.mrb[66].mxu1 %vm731_vm0, %v2934_v4  ;;  %v4968_v6 = vpop.f32.mrb[59].mxu1  ;;  %v3086_v7 = vadd.f32 %v3085_v3, %v3009_v0 }
 0xc1b   : > { %5005 = vmatprep.mubr.msk.f32.mxu0 %vm731_vm0, %v2927_v45  ;;  %4385 = vmatprep.mubr.msk.f32.mxu1 %vm2038_vm11, %v3440_v10  ;;  %v3471_v6 = vpop.permute.xlu1 %3470 }
 0xc1c   : > { %v3090_v9 = vadd.f32 %v3089_v8, %v3086_v7 }
 0xc1e   : > { %5006 = vmatmul.mubr.msk.f32.vlgmr.msra.gmra.mrb[64].mxu0 %vm731_vm0, %v2928_v41  ;;  %3091 = vst.msk [vmem:[%s720_s30] sm:$0xff] %vm2121_vm13, %v3090_v9  ;;  %s6493_s30 = sld [smem:[#allocation12_spill]] }
 0xc1f   : > { %5008 = vmatprep.mubr.msk.f32.mxu0 %vm731_vm0, %v2929_v16  ;;  %5231 = vmatpush3.bf16.msra.mxu0 %v6163_v27  ;;  %v3442_v16 = vld [vmem:[%s6417_s8 + $0x18] sm:$0xff] }
 0xc20   : > { %5233 = vmatprep.subr.bf16.mxu0 %v6171_v28 }
 0xc22   : > { %5009 = vmatmul.mubr.msk.f32.gmra.mrb[66].mxu0 %vm731_vm0, %v2930_v5 }
 0xc23   : > { %5011 = vmatprep.mubr.msk.f32.mxu0 %vm731_vm0, %v2931_v17  ;;  %v3449_v17 = vld [vmem:[%s6417_s8 + $0x50] sm:$0xff] }
 0xc24   : > { %s703_s26 = sand.u32 1, %s6493_s30  }
 0xc25   : > { %s4237_s3 = sshll.u32 %s703_s26, 4  ;;  %s6368_s4 = scalar_lea.sflag [#allocation4], %s703_s26 }
 0xc26   : > { %5012 = vmatmul.mubr.msk.f32.gmra.mrb[68].mxu0 %vm731_vm0, %v2932_v55  ;;  %v3446_v55 = vld [vmem:[%s6417_s8 + $0x38] sm:$0xff]  ;;  %s705_s17 = scalar_lea.vmem [#allocation7], %s4237_s3  ;;  %s5490_s3 = smov [#allocation7]  }
 0xc27   : > { %5014 = vmatprep.mubr.msk.f32.mxu0 %vm731_vm0, %v2933_v63  ;;  %s5414_s6 = sshll.u32 %s5490_s3, 4  ;;  %s5415_s6 = int_to_ptr.vmem [resolvable:$false] %s5414_s6 }
 0xc28   : > { %s5416_s0 = scalar_lea.vmem %s5415_s6, 512 }
 0xc2a   : > { %5015 = vmatmul.mubr.msk.f32.gmra.mrb[70].mxu0 %vm731_vm0, %v2934_v4  ;;  %v3453_v4 = vld [vmem:[%s6417_s8 + $0x70] sm:$0xff] }
 0xce1   : > { %v4975_v11 = vpop.f32.mrb[56].mxu0  ;;  %v4991_v15 = vpop.f32.mrb[60].mxu1 }
 0xce2   : > { %v3184_v20 = vpop.f32.mrb[57].mxu0  ;;  %v3292_v22 = vpop.f32.mrb[61].mxu1 }
 0xce3   : > { %v5193_v13 = vpack.c.bf16 %v4975_v11, %v3184_v20  ;;  %v5205_v24 = vpack.c.bf16 %v4991_v15, %v3292_v22  ;;  %v3476_v15 = vpop.permute.xlu0 %3475 }
 0xce5   : > { %v4978_v31 = vpop.f32.mrb[58].mxu0  ;;  %5194 = vmatpush1.bf16.msra.mxu1 %v5193_v13  ;;  %v4994_v32 = vpop.f32.mrb[62].mxu1 }
 0xce6   : > { %v3194_v14 = vpop.f32.mrb[59].mxu0  ;;  %5195 = vmatprep.subr.bf16.mxu1 %v5487_v50  ;;  %v3302_v33 = vpop.f32.mrb[63].mxu1 }
 0xce7   : > { %v5196_v21 = vpack.c.bf16 %v4978_v31, %v3194_v14  ;;  %v5208_v23 = vpack.c.bf16 %v4994_v32, %v3302_v33  ;;  %v3481_v32 = vpop.permute.xlu1 %3480 }
 0xce9   : > { %v4981_v25 = vpop.f32.mrb[60].mxu0  ;;  %5197 = vmatpush1.bf16.msra.mxu1 %v5196_v21  ;;  %v4997_v26 = vpop.f32.mrb[64].mxu1 }
 0xcea   : > { %v3204_v27 = vpop.f32.mrb[61].mxu0  ;;  %5198 = vmatprep.subr.bf16.mxu1 %v5487_v50  ;;  %v3312_v59 = vpop.f32.mrb[65].mxu1 }
 0xceb   : > { %v5199_v51 = vpack.c.bf16 %v4981_v25, %v3204_v27  ;;  %v5211_v29 = vpack.c.bf16 %v4997_v26, %v3312_v59  ;;  %v3486_v26 = vpop.permute.xlu0 %3485 }
 0xced   : > { %v4984_v30 = vpop.f32.mrb[62].mxu0  ;;  %5200 = vmatpush1.bf16.msra.mxu1 %v5199_v51  ;;  %v5000_v35 = vpop.f32.mrb[66].mxu1 }
 0xcee   : > { %v3214_v36 = vpop.f32.mrb[63].mxu0  ;;  %5201 = vmatprep.subr.bf16.mxu1 %v5487_v50  ;;  %v3322_v37 = vpop.f32.mrb[67].mxu1 }
 0xcef   : > { %v5202_v38 = vpack.c.bf16 %v4984_v30, %v3214_v36  ;;  %v5214_v39 = vpack.c.bf16 %v5000_v35, %v3322_v37  ;;  %v3491_v30 = vpop.permute.xlu1 %3490 }
 0xcf1   : > { %v5007_v40 = vpop.f32.mrb[64].mxu0  ;;  %5203 = vmatpush1.bf16.msra.mxu1 %v5202_v38 }
 0xcf2   : > { %v3400_v41 = vpop.f32.mrb[65].mxu0  ;;  %5204 = vmatprep.subr.bf16.mxu1 %v5487_v50 }
 0xcf3   : > { %v5217_v42 = vpack.c.bf16 %v5007_v40, %v3400_v41  ;;  %v3496_v40 = vpop.permute.xlu0 %3495 }
 0xcf5   : > { %v5010_v43 = vpop.f32.mrb[66].mxu0  ;;  %5206 = vmatpush1.bf16.msra.mxu1 %v5205_v24 }
 0xcf6   : > { %v3410_v44 = vpop.f32.mrb[67].mxu0  ;;  %5207 = vmatprep.subr.bf16.mxu1 %v5487_v50 }
 0xcf7   : > { %v5220_v45 = vpack.c.bf16 %v5010_v43, %v3410_v44 }
 0xcf9   : > { %v5013_v46 = vpop.f32.mrb[68].mxu0  ;;  %5209 = vmatpush1.bf16.msra.mxu1 %v5208_v23 }
 0xcfa   : > { %v3420_v47 = vpop.f32.mrb[69].mxu0  ;;  %5210 = vmatprep.subr.bf16.mxu1 %v5487_v50 }
 0xcfb   : > { %v5223_v48 = vpack.c.bf16 %v5013_v46, %v3420_v47  ;;  %v3501_v46 = vpop.permute.xlu1 %3500 }
 0xcfd   : > { %v5016_v5 = vpop.f32.mrb[70].mxu0  ;;  %5212 = vmatpush1.bf16.msra.mxu1 %v5211_v29 }
 0xcfe   : > { %v3430_v49 = vpop.f32.mrb[71].mxu0  ;;  %5213 = vmatprep.subr.bf16.mxu1 %v5487_v50 }
 0xcff   : > { %v5226_v2 = vpack.c.bf16 %v5016_v5, %v3430_v49 }
 0xd01   : > { %5215 = vmatpush1.bf16.msra.mxu1 %v5214_v39 }
 0xd02   : > { %5216 = vmatprep.subr.bf16.mxu1 %v5487_v50 }
 0xd05   : > { %5218 = vmatpush1.bf16.msra.mxu1 %v5217_v42 }
 0xd06   : > { %5219 = vmatprep.subr.bf16.mxu1 %v5487_v50 }
 0xd09   : > { %5221 = vmatpush1.bf16.msra.mxu1 %v5220_v45 }
 0xd0a   : > { %5222 = vmatprep.subr.bf16.mxu1 %v5487_v50 }
 0xd0d   : > { %5224 = vmatpush1.bf16.msra.mxu1 %v5223_v48 }
 0xd0e   : > { %5225 = vmatprep.subr.bf16.mxu1 %v5487_v50 }
 0xd11   : > { %5227 = vmatpush1.bf16.msra.mxu1 %v5226_v2 }
 0xd12   : > { %5240 = vmatprep.subr.bf16.mxu1 %v5487_v50 }
 0xd14   : > { %3592 = vmatmul.mubr.f32.vlgmr.msra.gmra.mrb[68].mxu1 %v3439_v52 }
 0xd15   : > { %4386 = vmatprep.mubr.msk.f32.mxu1 %vm2038_vm11, %v3442_v16 }
 0xd18   : > { %3597 = vmatmul.mubr.f32.gmra.mrb[70].mxu1 %v3441_v12 }
 0xd19   : > { %4387 = vmatprep.mubr.msk.f32.mxu1 %vm2038_vm11, %v3444_v53 }
 0xd1c   : > { %3602 = vmatmul.mubr.f32.gmra.mrb[72].mxu1 %v3443_v54 }
 0xd1d   : > { %4388 = vmatprep.mubr.msk.f32.mxu1 %vm2038_vm11, %v3446_v55 }
 0xd20   : > { %3607 = vmatmul.mubr.f32.gmra.mrb[74].mxu1 %v3445_v56 }
 0xd21   : > { %4389 = vmatprep.mubr.msk.f32.mxu1 %vm2038_vm11, %v3448_v19 }
 0xd24   : > { %3612 = vmatmul.mubr.f32.gmra.mrb[76].mxu1 %v3447_v57 }
 0xd25   : > { %4390 = vmatprep.mubr.msk.f32.mxu1 %vm2038_vm11, %v3450_v58 }
 0xd28   : > { %3617 = vmatmul.mubr.f32.gmra.mrb[78].mxu1 %v3449_v17 }
 0xd29   : > { %4391 = vmatprep.mubr.msk.f32.mxu1 %vm2038_vm11, %v3452_v60 }
 0xd2c   : > { %3622 = vmatmul.mubr.f32.gmra.mrb[80].mxu1 %v3451_v18 }
 0xd2d   : > { %4392 = vmatprep.mubr.msk.f32.mxu1 %vm2038_vm11, %v3454_v61 }
 0xd30   : > { %3627 = vmatmul.mubr.f32.gmra.mrb[82].mxu1 %v3453_v4 }
 0xde7   : > { %v3593_v63 = vpop.f32.mrb[68].mxu1 }
 0xde8   : > { %v3594_v0 = vadd.f32 %v3593_v63, %v3466_v62  ;;  %v3595_v1 = vpop.f32.mrb[69].mxu1 }
 0xdea   : > { %vm3632_vm1 = vcmp.ge.f32.partialorder %v3594_v0, 0.0  ;;  %v3640_v3 = vmul.f32 0.1, %v3594_v0 }
 0xdeb   : > { %v3598_v7 = vpop.f32.mrb[70].mxu1 }
 0xdec   : > { %v3599_v8 = vadd.f32 %v3598_v7, %v3471_v6  ;;  %v6300_v9 = vsel %vm3632_vm1, %v3594_v0, %v3640_v3  ;;  %v3600_v10 = vpop.f32.mrb[71].mxu1 }
 0xded   : > { %5021 = vmatprep.mubr.msk.f32.mxu0 %vm731_vm0, %v6300_v9 }
 0xdee   : > { %vm3633_vm2 = vcmp.ge.f32.partialorder %v3599_v8, 0.0  ;;  %v3641_v11 = vmul.f32 0.1, %v3599_v8 }
 0xdef   : > { %v3603_v20 = vpop.f32.mrb[72].mxu1 }
 0xdf0   : > { %v3649_v22 = vsel %vm3633_vm2, %v3599_v8, %v3641_v11  ;;  %v3604_v13 = vadd.f32 %v3603_v20, %v3476_v15  ;;  %v3605_v24 = vpop.f32.mrb[73].mxu1 }
 0xdf1   : > { %5022 = vmatmul.mubr.msk.f32.vlgmr.msra.gmra.mrb[72].mxu0 %vm731_vm0, %v3649_v22 }
 0xdf2   : > { %vm3634_vm3 = vcmp.ge.f32.partialorder %v3604_v13, 0.0  ;;  %v3642_v31 = vmul.f32 0.1, %v3604_v13  ;;  %5235 = vmatpush3.bf16.msra.mxu0 %v6171_v28 }
 0xdf3   : > { %v3608_v14 = vpop.f32.mrb[74].mxu1  ;;  %5237 = vmatprep.subr.bf16.mxu0 %v6185_v34 }
 0xdf4   : > { %v3609_v33 = vadd.f32 %v3608_v14, %v3481_v32  ;;  %v3650_v21 = vsel %vm3634_vm3, %v3604_v13, %v3642_v31  ;;  %v3610_v23 = vpop.f32.mrb[75].mxu1 }
 0xdf5   : > { %5024 = vmatprep.mubr.msk.f32.mxu0 %vm731_vm0, %v3650_v21 }
 0xdf6   : > { %vm3635_vm4 = vcmp.ge.f32.partialorder %v3609_v33, 0.0  ;;  %v3643_v25 = vmul.f32 0.1, %v3609_v33 }
 0xdf7   : > { %v3613_v27 = vpop.f32.mrb[76].mxu1 }
 0xdf8   : > { %v3614_v59 = vadd.f32 %v3613_v27, %v3486_v26  ;;  %v3651_v51 = vsel %vm3635_vm4, %v3609_v33, %v3643_v25  ;;  %v3615_v29 = vpop.f32.mrb[77].mxu1  ;;  %v3995_v25 = vld [vmem:[%s6492_s24] sm:$0xff]  ;;  %v3998_v26 = vld [vmem:[%s6492_s24 + $0x18] sm:$0xff]  ;;  %v3997_v27 = vld [vmem:[%s6492_s24 + $0x10] sm:$0xff] }
 0xdf9   : > { %5025 = vmatmul.mubr.msk.f32.gmra.mrb[74].mxu0 %vm731_vm0, %v3651_v51 }
 0xdfa   : > { %vm3636_vm5 = vcmp.ge.f32.partialorder %v3614_v59, 0.0  ;;  %v3644_v28 = vmul.f32 0.1, %v3614_v59 }
 0xdfb   : > { %v3618_v35 = vpop.f32.mrb[78].mxu1 }
 0xdfc   : > { %v3619_v36 = vadd.f32 %v3618_v35, %v3491_v30  ;;  %v3652_v37 = vsel %vm3636_vm5, %v3614_v59, %v3644_v28  ;;  %v3620_v38 = vpop.f32.mrb[79].mxu1  ;;  %v4009_v30 = vpop.permute.xlu1 %4008 }
 0xdfd   : > { %5027 = vmatprep.mubr.msk.f32.mxu0 %vm731_vm0, %v3652_v37 }
 0xdfe   : > { %vm3637_vm6 = vcmp.ge.f32.partialorder %v3619_v36, 0.0  ;;  %v3645_v39 = vmul.f32 0.1, %v3619_v36 }
 0xdff   : > { %v3623_v41 = vpop.f32.mrb[80].mxu1 }
 0xe00   : > { %v3624_v42 = vadd.f32 %v3623_v41, %v3496_v40  ;;  %v3653_v43 = vsel %vm3637_vm6, %v3619_v36, %v3645_v39  ;;  %v3625_v44 = vpop.f32.mrb[81].mxu1 }
 0xe01   : > { %5028 = vmatmul.mubr.msk.f32.gmra.mrb[76].mxu0 %vm731_vm0, %v3653_v43 }
 0xe02   : > { %vm3638_vm7 = vcmp.ge.f32.partialorder %v3624_v42, 0.0  ;;  %v3646_v45 = vmul.f32 0.1, %v3624_v42 }
 0xe03   : > { %v3628_v47 = vpop.f32.mrb[82].mxu1 }
 0xe04   : > { %v3629_v48 = vadd.f32 %v3628_v47, %v3501_v46  ;;  %v3654_v5 = vsel %vm3638_vm7, %v3624_v42, %v3646_v45  ;;  %v3630_v49 = vpop.f32.mrb[83].mxu1 }
 0xe05   : > { %5030 = vmatprep.mubr.msk.f32.mxu0 %vm731_vm0, %v3654_v5 }
 0xe06   : > { %vm3639_vm8 = vcmp.ge.f32.partialorder %v3629_v48, 0.0  ;;  %v3647_v2 = vmul.f32 0.1, %v3629_v48 }
 0xe08   : > { %v3655_v52 = vsel %vm3639_vm8, %v3629_v48, %v3647_v2 }
 0xe09   : > { %5031 = vmatmul.mubr.msk.f32.gmra.mrb[78].mxu0 %vm731_vm0, %v3655_v52 }
 0xe0a   : > { %5037 = vmatprep.mubr.msk.f32.mxu0 %vm731_vm0, %v6300_v9 }
 0xe0d   : > { %5038 = vmatmul.mubr.msk.f32.vlgmr.msra.gmra.mrb[80].mxu0 %vm731_vm0, %v3649_v22 }
 0xe0e   : > { %5040 = vmatprep.mubr.msk.f32.mxu0 %vm731_vm0, %v3650_v21  ;;  %5239 = vmatpush3.bf16.msra.mxu0 %v6185_v34  ;;  %v3996_v34 = vld [vmem:[%s6491_s29 + $0x8] sm:$0xff]  ;;  %s4118_s29 = sshll.u32 %s705_s17, 4  ;;  %s6365_s29 = int_to_ptr.vmem [resolvable:$true] %s4118_s29 }
 0xe0f   : > { %4417 = vmatprep.mubr.msk.f32.mxu1 %vm2038_vm11, %v3996_v34  ;;  %s5410_s21 = scalar_lea.vmem %s6365_s29, 256  ;;  %p5417_p4 = scmp.lt.s32.totalorder %s6365_s29, %s5415_s6 }
 0xe10   : > { %p5411_p12 = scmp.ne.s32.totalorder %s6365_s29, %s5410_s21  ;;  %p5418_p7 = scmp.lt.s32.totalorder %s5416_s0, %s5410_s21 }
 0xe11   : > { %5041 = vmatmul.mubr.msk.f32.gmra.mrb[82].mxu0 %vm731_vm0, %v3651_v51 }
 0xe12   : > { %5043 = vmatprep.mubr.msk.f32.mxu0 %vm731_vm0, %v3652_v37  ;;  %p5412_p2 = pnand %p5411_p12, %p6496_p1  ;;  %p5419_p8 = por %p5418_p7, %p5417_p4 }
 0xe14   : > { %p5413_p3 = pneg %p5412_p2 }
 0xe15   : > { %5044 = vmatmul.mubr.msk.f32.gmra.mrb[84].mxu0 %vm731_vm0, %v3653_v43 }
 0xe16   : > { %5046 = vmatprep.mubr.msk.f32.mxu0 %vm731_vm0, %v3654_v5  ;;  %p5420_p11 = pnand %p5419_p8, %p5413_p3 }
 0xe19   : > { %5047 = vmatmul.mubr.msk.f32.gmra.mrb[86].mxu0 %vm731_vm0, %v3655_v52 }
 0xe1a   : > { %5053 = vmatprep.mubr.msk.f32.mxu0 %vm731_vm0, %v6300_v9 }
 0xe1d   : > { %5054 = vmatmul.mubr.msk.f32.vlgmr.msra.gmra.mrb[88].mxu0 %vm731_vm0, %v3649_v22 }
 0xe1e   : > { %5056 = vmatprep.mubr.msk.f32.mxu0 %vm731_vm0, %v3650_v21 }
 0xe21   : > { %5057 = vmatmul.mubr.msk.f32.gmra.mrb[90].mxu0 %vm731_vm0, %v3651_v51 }
 0xe22   : > { %5059 = vmatprep.mubr.msk.f32.mxu0 %vm731_vm0, %v3652_v37 }
 0xe25   : > { %5060 = vmatmul.mubr.msk.f32.gmra.mrb[92].mxu0 %vm731_vm0, %v3653_v43 }
 0xe26   : > { %5062 = vmatprep.mubr.msk.f32.mxu0 %vm731_vm0, %v3654_v5 }
 0xe29   : > { %5063 = vmatmul.mubr.msk.f32.gmra.mrb[94].mxu0 %vm731_vm0, %v3655_v52 }
 0xec4   : > { %v5023_v16 = vpop.f32.mrb[72].mxu0 }
 0xec5   : > { %v3746_v12 = vpop.f32.mrb[73].mxu0 }
 0xec6   : > { %v5241_v53 = vpack.c.bf16 %v5023_v16, %v3746_v12 }
 0xec8   : > { %5242 = vmatpush1.bf16.msra.mxu1 %v5241_v53 }
 0xec9   : > { %5243 = vmatprep.subr.bf16.mxu1 %v5487_v50 }
 0xecc   : > { %v5026_v54 = vpop.f32.mrb[74].mxu0 }
 0xecd   : > { %v3756_v55 = vpop.f32.mrb[75].mxu0 }
 0xece   : > { %v5244_v56 = vpack.c.bf16 %v5026_v54, %v3756_v55 }
 0xed0   : > { %5245 = vmatpush1.bf16.msra.mxu1 %v5244_v56 }
 0xed1   : > { %5246 = vmatprep.subr.bf16.mxu1 %v5487_v50 }
 0xed4   : > { %v5029_v19 = vpop.f32.mrb[76].mxu0 }
 0xed5   : > { %v3766_v57 = vpop.f32.mrb[77].mxu0 }
 0xed6   : > { %v5247_v58 = vpack.c.bf16 %v5029_v19, %v3766_v57 }
 0xed8   : > { %5248 = vmatpush1.bf16.msra.mxu1 %v5247_v58 }
 0xed9   : > { %5249 = vmatprep.subr.bf16.mxu1 %v5487_v50 }
 0xedc   : > { %v5032_v17 = vpop.f32.mrb[78].mxu0 }
 0xedd   : > { %v3776_v60 = vpop.f32.mrb[79].mxu0 }
 0xede   : > { %v5250_v18 = vpack.c.bf16 %v5032_v17, %v3776_v60 }
 0xee0   : > { %v5039_v61 = vpop.f32.mrb[80].mxu0  ;;  %5251 = vmatpush1.bf16.msra.mxu1 %v5250_v18 }
 0xee1   : > { %v3851_v4 = vpop.f32.mrb[81].mxu0  ;;  %5252 = vmatprep.subr.bf16.mxu1 %v5487_v50 }
 0xee2   : > { %v5253_v62 = vpack.c.bf16 %v5039_v61, %v3851_v4 }
 0xee4   : > { %v5042_v63 = vpop.f32.mrb[82].mxu0  ;;  %5254 = vmatpush1.bf16.msra.mxu1 %v5253_v62 }
 0xee5   : > { %v3861_v0 = vpop.f32.mrb[83].mxu0  ;;  %5255 = vmatprep.subr.bf16.mxu1 %v5487_v50 }
 0xee6   : > { %v5256_v1 = vpack.c.bf16 %v5042_v63, %v3861_v0 }
 0xee8   : > { %v5045_v3 = vpop.f32.mrb[84].mxu0  ;;  %5257 = vmatpush1.bf16.msra.mxu1 %v5256_v1 }
 0xee9   : > { %v3871_v6 = vpop.f32.mrb[85].mxu0  ;;  %5258 = vmatprep.subr.bf16.mxu1 %v5487_v50 }
 0xeea   : > { %v5259_v7 = vpack.c.bf16 %v5045_v3, %v3871_v6 }
 0xeec   : > { %v5048_v8 = vpop.f32.mrb[86].mxu0  ;;  %5260 = vmatpush1.bf16.msra.mxu1 %v5259_v7 }
 0xeed   : > { %v3881_v9 = vpop.f32.mrb[87].mxu0  ;;  %5261 = vmatprep.subr.bf16.mxu1 %v5487_v50 }
 0xeee   : > { %v5262_v10 = vpack.c.bf16 %v5048_v8, %v3881_v9 }
 0xef0   : > { %v5055_v11 = vpop.f32.mrb[88].mxu0  ;;  %5263 = vmatpush1.bf16.msra.mxu1 %v5262_v10 }
 0xef1   : > { %v3956_v15 = vpop.f32.mrb[89].mxu0  ;;  %5264 = vmatprep.subr.bf16.mxu1 %v5487_v50 }
 0xef2   : > { %v5265_v20 = vpack.c.bf16 %v5055_v11, %v3956_v15 }
 0xef4   : > { %v5058_v22 = vpop.f32.mrb[90].mxu0  ;;  %5266 = vmatpush1.bf16.msra.mxu1 %v5265_v20 }
 0xef5   : > { %v3966_v13 = vpop.f32.mrb[91].mxu0  ;;  %5267 = vmatprep.subr.bf16.mxu1 %v5487_v50 }
 0xef6   : > { %v5268_v24 = vpack.c.bf16 %v5058_v22, %v3966_v13 }
 0xef8   : > { %v5061_v31 = vpop.f32.mrb[92].mxu0  ;;  %5269 = vmatpush1.bf16.msra.mxu1 %v5268_v24 }
 0xef9   : > { %v3976_v32 = vpop.f32.mrb[93].mxu0  ;;  %5270 = vmatprep.subr.bf16.mxu1 %v5487_v50 }
 0xefa   : > { %v5271_v14 = vpack.c.bf16 %v5061_v31, %v3976_v32 }
 0xefc   : > { %v5064_v33 = vpop.f32.mrb[94].mxu0  ;;  %5272 = vmatpush1.bf16.msra.mxu1 %v5271_v14 }
 0xefd   : > { %v3986_v21 = vpop.f32.mrb[95].mxu0  ;;  %5273 = vmatprep.subr.bf16.mxu1 %v5487_v50  ;;  %v4004_v50 = vpop.permute.xlu0 %4003 }
 0xefe   : > { %v5274_v23 = vpack.c.bf16 %v5064_v33, %v3986_v21 }
 0xf00   : > { %5275 = vmatpush1.bf16.msra.mxu1 %v5274_v23 }
 0xf03   : > { %4082 = vmatmul.mubr.f32.vlgmr.msra.gmra.mrb[84].mxu1 %v3995_v25 }
 0xf04   : > { %4418 = vmatprep.mubr.msk.f32.mxu1 %vm2038_vm11, %v3998_v26 }
 0xf07   : > { %4087 = vmatmul.mubr.f32.gmra.mrb[86].mxu1 %v3997_v27 }
 0xfd6   : > { %v4083_v59 = vpop.f32.mrb[84].mxu1 }
 0xfd7   : > { %v4084_v51 = vadd.f32 %v4083_v59, %v4004_v50  ;;  %v4085_v29 = vpop.f32.mrb[85].mxu1 }
 0xfd9   : > { %vm4092_vm9 = vcmp.ge.f32.partialorder %v4084_v51, 0.0  ;;  %v4094_v28 = vmul.f32 0.1, %v4084_v51 }
 0xfda   : > { %v4088_v35 = vpop.f32.mrb[86].mxu1 }
 0xfdb   : > { %v4096_v36 = vsel %vm4092_vm9, %v4084_v51, %v4094_v28  ;;  %v4089_v37 = vadd.f32 %v4088_v35, %v4009_v30  ;;  %v4090_v38 = vpop.f32.mrb[87].mxu1 }
 0xfdc   : > { %4098 = vst.msk [vmem:[%s705_s17] sm:$0xff] %vm731_vm0, %v4096_v36 }
 0xfdd   : > { %vm4093_vm10 = vcmp.ge.f32.partialorder %v4089_v37, 0.0  ;;  %v4095_v39 = vmul.f32 0.1, %v4089_v37 }
 0xfdf   : > { %v4097_v40 = vsel %vm4093_vm10, %v4089_v37, %v4095_v39 }
 0xfe0   : > { %4099 = vst.msk [vmem:[%s705_s17 + $0x8] sm:$0xff] %vm731_vm0, %v4097_v40 }
 0xfe1   : > { %5423 = shalt.err (!%p5420_p11)
}
 0xfe2   : > { %s5424_s26 = scalar_lea.hbm %s6363_s28, 256  ;;  %s5428_s1 = scalar_lea.hbm %s6495_s5, 512 }
 0xfe3   : > { %p5425_p13 = scmp.ne.s32.totalorder %s6363_s28, %s5424_s26  ;;  %p5429_p6 = scmp.lt.u32.totalorder %s6363_s28, %s6495_s5 }
 0xfe4   : > { %p5430_p9 = scmp.lt.u32.totalorder %s5428_s1, %s5424_s26  ;;  %p5432_p12 = scmp.lt.u32.totalorder %s5424_s26, %s6363_s28 }
 0xfe5   : > { %p5426_p0 = pnand %p5425_p13, %p6496_p1 }
 0xfe6   : > { %p5431_p10 = por %p5430_p9, %p5429_p6 }
 0xfe7   : > { %p5427_p5 = pneg %p5426_p0 }
 0xfe8   : > { %p5433_p2 = por %p5432_p12, %p5431_p10 }
 0xfea   : > { %p5434_p3 = pnand %p5433_p2, %p5427_p5 }
 0xfec   : > { %5437 = shalt.err (!%p5434_p3)
}
 0xfed   : > { %s5491_s21 = smov 128   ;;  %s5492_s0 = smov 8  }
 0xfee   : > { %5286 = dma.vmem_to_hbm [thread:$0]  (%p6496_p1), %s6365_s29, 256, %s6363_s28, %s6368_s4, %s5491_s21, %s5491_s21, %s5492_s0  }
 0xfef PF: > { %s6497_s17 = sld [smem:[#allocation14_spill]]  ;;  %s6498_s30 = sld [smem:[#allocation11_spill]] }
 0xff0   : > { %s6499_s7 = sld [smem:[#allocation18_spill]] }
 0xff5   : > { %p5303_p4 = scmp.ge.s32.totalorder %s6497_s17, 2  ;;  %s4136_s3 = sand.u32 1, %s6498_s30  }
 0xff6   : > { %p6500_p7 = scmp.ne.s32.totalorder %s6499_s7, 0  ;;  %s4137_s26 = scalar_lea.sflag [#allocation4], %s4136_s3 }
 0xff8   : > { %p5296_p8 = pnand %p5303_p4, %p6500_p7 }
 0xffa   : > { %5463 = dma.done.wait (!%p5296_p8), %s4137_s26, 256  }
 0xffb   : > { %5465 = vsyncadd (!%p5296_p8), %s4137_s26, 4294967040  ;;  %s6501_s30 = sld [smem:[#allocation15_spill]]  ;;  %s6502_s3 = sld [smem:[#allocation12_spill]] }
 0xffc   : > { %s6503_s28 = sld [smem:[#allocation13_spill]]  ;;  %s6504_s29 = sld [smem:[#allocation16_spill]] }
0x1001   : > { %p35_p11 = scmp.ge.s32.totalorder %s6501_s30, 4  }
0x1003   :  { %37 = sbr.rel (!%p35_p11) target bundleno = 17 (0x11), region = 168 }
0x100a   :  { %4149 = vsyncpa [#allocation3], 1 }
0x100b   :  { %4151 = vsyncpa [#allocation3 + $0x1], 1 }
0x100c   :  { %4152 = vsyncpa [#allocation6], 1 }
0x100d   :  { %4153 = vsyncpa [#allocation4], 1 }
0x100e   :  { %4155 = vsyncpa [#allocation4 + $0x1], 1 }

</bundles_post_ra>
